<compile_context>
chip_gen: v6e
topology: v6e:2x2x1
jax: 0.10.0
libtpu: 0.0.40
codegen_flags: <defaults>
</compile_context>

<pallas_src>
import jax
import jax.numpy as jnp
from jax.experimental import pallas as pl
from jax.experimental.pallas import tpu as pltpu


def _round_up(n, m):
    return ((n + m - 1) // m) * m


def _fused_forward_kernel(x_ref, wf_ref, w12_ref, b_ref, out_ref):
    """feats = (6*Bt,D)@(D,F);  out = b_total + sum_i feats_i @ W12[i]."""
    six, bt, d = x_ref.shape
    f = wf_ref.shape[1]
    ncp = out_ref.shape[1]

    # Pass 1: one MXU-dense matmul over all 6 views at once (view axis folded
    # into M; merging (6, Bt, D) -> (6*Bt, D) is layout-free for Bt % 8 == 0).
    xb = x_ref[...].reshape(six * bt, d)
    feats = jnp.dot(xb, wf_ref[...],
                    preferred_element_type=jnp.float32)        # (6*Bt, F) f32
    feats = feats.reshape(six, bt, f).astype(wf_ref.dtype)     # bf16 for pass 2

    # Pass 2: fc1 -> fc2 (pre-folded).  Per-view accumulation against static
    # slices of W12 avoids materializing the (Bt, 3072) concat.
    acc = jnp.broadcast_to(b_ref[...], (bt, ncp)).astype(jnp.float32)
    for i in range(six):                                       # static unroll
        acc = acc + jnp.dot(feats[i], w12_ref[i],
                            preferred_element_type=jnp.float32)
    out_ref[...] = acc.astype(out_ref.dtype)


def res_onlypdface_freeze_forward(x, params, *, block_b=256,
                                  compute_dtype=jnp.bfloat16):
    """x: (6, B, C, H, W) float32 (one NCHW image per view). -> (B, num_classes)."""
    wf, bf, w1, b1, w2, b2 = params
    six, B, C, H, W = x.shape
    assert six == 6
    D = C * H * W
    F = wf.shape[1]
    NC = w2.shape[1]
    assert w1.shape[0] == six * F == 3072

    # --- Offline folding (fc1 -> fc2 has no nonlinearity in between) --------
    w12 = w1 @ w2                                              # (3072, NC) f32
    b_tot = jnp.tile(bf, (1, six)) @ w12 + b1 @ w2 + b2        # (1, NC)   f32

    # Lane-dense output: pad the class dim to a multiple of 128.
    NCp = max(128, _round_up(NC, 128))
    w12_3d = jnp.zeros((six, F, NCp), jnp.float32).at[:, :, :NC].set(
        w12.reshape(six, F, NC))
    b_totp = jnp.zeros((1, NCp), jnp.float32).at[:, :NC].set(b_tot)

    # --- Flatten per-view images (torch .view(B, -1)) and tile the batch ----
    x_flat = x.reshape(six, B, D)
    Bt = min(block_b, _round_up(B, 8))                         # sublane-dense tile
    Bp = _round_up(B, Bt)
    if Bp != B:
        x_flat = jnp.pad(x_flat, ((0, 0), (0, Bp - B), (0, 0)))

    # bf16 MXU inputs (f32 accumulation inside the kernel).
    x_c = x_flat.astype(compute_dtype)
    wf_c = wf.astype(compute_dtype)
    w12_c = w12_3d.astype(compute_dtype)

    grid = (Bp // Bt,)
    itemsize = jnp.dtype(compute_dtype).itemsize
    flops = 2 * Bp * six * (D * F + F * NCp)
    bytes_accessed = (six * Bp * D * itemsize + D * F * itemsize
                      + six * F * NCp * itemsize + NCp * 4 + Bp * NCp * 4)

    out = pl.pallas_call(
        _fused_forward_kernel,
        out_shape=jax.ShapeDtypeStruct((Bp, NCp), jnp.float32),
        grid=grid,
        in_specs=[
            pl.BlockSpec((six, Bt, D), lambda i: (0, i, 0)),   # x: tiled over B
            pl.BlockSpec((D, F), lambda i: (0, 0)),            # feature weight
            pl.BlockSpec((six, F, NCp), lambda i: (0, 0, 0)),  # folded fc1@fc2
            pl.BlockSpec((1, NCp), lambda i: (0, 0)),          # folded bias
        ],
        out_specs=pl.BlockSpec((Bt, NCp), lambda i: (i, 0)),
        compiler_params=pltpu.CompilerParams(
            dimension_semantics=("parallel",),
            vmem_limit_bytes=48 * 1024 * 1024),
        cost_estimate=pl.CostEstimate(flops=flops, transcendentals=0,
                                      bytes_accessed=bytes_accessed),
    )(x_c, wf_c, w12_c, b_totp)

    return out[:B, :NC]


def _reference_forward(x, params):
    """Pure-f32 reference following the module exactly."""
    wf, bf, w1, b1, w2, b2 = params
    six, B = x.shape[0], x.shape[1]
    x_flat = x.reshape(six, B, -1)
    feats = [x_flat[i] @ wf + bf for i in range(six)]
    cat = jnp.concatenate(feats, axis=-1)
    h = cat @ w1 + b1
    return h @ w2 + b2


def _matched_precision_reference(x, params, compute_dtype=jnp.bfloat16):
    """Same math as the kernel (bf16 inputs, f32 accumulation, folded fc2)."""
    wf, bf, w1, b1, w2, b2 = params
    six, B = x.shape[0], x.shape[1]
    F = wf.shape[1]
    w12 = w1 @ w2
    b_tot = jnp.tile(bf, (1, six)) @ w12 + b1 @ w2 + b2
    xf = x.reshape(six, B, -1).astype(compute_dtype)
    wfc = wf.astype(compute_dtype)
    w12c = w12.astype(compute_dtype)
    acc = jnp.broadcast_to(b_tot, (B, w12.shape[1])).astype(jnp.float32)
    for i in range(six):
        fi = jnp.dot(xf[i], wfc,
                     preferred_element_type=jnp.float32).astype(compute_dtype)
        acc = acc + jnp.dot(fi, w12c[i * F:(i + 1) * F],
                            preferred_element_type=jnp.float32)
    return acc


def _init_params(key, D, feat_dim=512, hidden=256, num_classes=8):
    ks = jax.random.split(key, 6)
    wf = jax.random.normal(ks[0], (D, feat_dim), jnp.float32) * 0.02
    bf = jax.random.normal(ks[1], (1, feat_dim), jnp.float32) * 0.01
    w1 = jax.random.normal(ks[2], (6 * feat_dim, hidden), jnp.float32) * 0.02
    b1 = jax.random.normal(ks[3], (1, hidden), jnp.float32) * 0.01
    w2 = jax.random.normal(ks[4], (hidden, num_classes), jnp.float32) * 0.02
    b2 = jax.random.normal(ks[5], (1, num_classes), jnp.float32) * 0.01
    return wf, bf, w1, b1, w2, b2


if __name__ == "__main__":
    key = jax.random.PRNGKey(0)
    k_x, k_p = jax.random.split(key)

    B, C, H, W = 2, 3, 16, 16          # 6 views, one NCHW image per view
    num_classes = 8
    D = C * H * W                      # 768

    x = jax.random.normal(k_x, (6, B, C, H, W), jnp.float32)
    params = _init_params(k_p, D, feat_dim=512, hidden=256,
                          num_classes=num_classes)

    out = res_onlypdface_freeze_forward(x, params)
    out = jax.block_until_ready(out)
    assert out.shape == (B, num_classes)

    # Tight check vs. a reference computed with the same (bf16-in, f32-acc,
    # folded-fc2) arithmetic -> verifies kernel logic.
    ref_matched = _matched_precision_reference(x, params)
    assert jnp.allclose(out, ref_matched, atol=1e-2, rtol=1e-2), \
        "mismatch vs matched-precision reference"

    # Loose check vs. the exact f32 module forward -> verifies overall accuracy
    # of the bf16 compute path.
    ref_f32 = _reference_forward(x, params)
    assert jnp.allclose(out, ref_f32, atol=5e-2, rtol=5e-2), \
        "mismatch vs f32 module reference"

    print("KERNEL_OK")
</pallas_src>

<mosaic_0001>
module attributes {stable_mosaic.version = 11 : i64} {
  func.func @_fused_forward_kernel(%arg0: i32, %arg1: memref<6x8x768xbf16, #tpu.memory_space<vmem>>, %arg2: memref<768x512xbf16, #tpu.memory_space<vmem>>, %arg3: memref<6x512x128xbf16, #tpu.memory_space<vmem>>, %arg4: memref<1x128xf32, #tpu.memory_space<vmem>>, %arg5: memref<8x128xf32, #tpu.memory_space<vmem>>) attributes {dimension_semantics = [#tpu.dimension_semantics<parallel>], iteration_bounds = array<i64: 1>, scalar_prefetch = 0 : i64, scratch_operands = 0 : i64, tpu.core_type = #tpu.core_type<tc>, window_params = [{transform_indices = @transform_0, window_bounds = array<i64: 6, 8, 768>}, {pipeline_mode = #tpu.pipeline_mode<synchronous>, transform_indices = @transform_1, window_bounds = array<i64: 768, 512>}, {pipeline_mode = #tpu.pipeline_mode<synchronous>, transform_indices = @transform_2, window_bounds = array<i64: 6, 512, 128>}, {pipeline_mode = #tpu.pipeline_mode<synchronous>, transform_indices = @transform_3, window_bounds = array<i64: 1, 128>}, {transform_indices = @transform_4, window_bounds = array<i64: 8, 128>}]} {
    %c0 = arith.constant 0 : index
    %c0_0 = arith.constant 0 : index
    %c0_1 = arith.constant 0 : index
    %0 = vector.load %arg1[%c0, %c0_0, %c0_1] : memref<6x8x768xbf16, #tpu.memory_space<vmem>>, vector<6x8x768xbf16>
    %1 = vector.shape_cast %0 : vector<6x8x768xbf16> to vector<48x768xbf16>
    %c0_2 = arith.constant 0 : index
    %c0_3 = arith.constant 0 : index
    %2 = vector.load %arg2[%c0_2, %c0_3] : memref<768x512xbf16, #tpu.memory_space<vmem>>, vector<768x512xbf16>
    %cst = arith.constant dense<0.000000e+00> : vector<48x512xf32>
    %3 = tpu.matmul %1, %2, %cst {dimension_numbers = #tpu.dot_dimension_numbers<[1], [0], [0], [1], [0, 0, 1, 1], [], []>} : vector<48x768xbf16>, vector<768x512xbf16>, vector<48x512xf32> -> vector<48x512xf32>
    %4 = vector.shape_cast %3 : vector<48x512xf32> to vector<6x8x512xf32>
    %5 = arith.truncf %4 : vector<6x8x512xf32> to vector<6x8x512xbf16>
    %c0_4 = arith.constant 0 : index
    %c0_5 = arith.constant 0 : index
    %6 = vector.load %arg4[%c0_4, %c0_5] : memref<1x128xf32, #tpu.memory_space<vmem>>, vector<1x128xf32>
    %7 = vector.shape_cast %6 : vector<1x128xf32> to vector<1x128xf32>
    %8 = vector.broadcast %7 : vector<1x128xf32> to vector<8x128xf32>
    %9 = vector.extract_strided_slice %5 {offsets = [0, 0, 0], sizes = [1, 8, 512], strides = [1, 1, 1]} : vector<6x8x512xbf16> to vector<1x8x512xbf16>
    %10 = vector.shape_cast %9 : vector<1x8x512xbf16> to vector<8x512xbf16>
    %c0_6 = arith.constant 0 : index
    %c0_7 = arith.constant 0 : index
    %c0_8 = arith.constant 0 : index
    %11 = vector.load %arg3[%c0_6, %c0_7, %c0_8] : memref<6x512x128xbf16, #tpu.memory_space<vmem>>, vector<1x512x128xbf16>
    %12 = vector.shape_cast %11 : vector<1x512x128xbf16> to vector<512x128xbf16>
    %cst_9 = arith.constant dense<0.000000e+00> : vector<8x128xf32>
    %13 = tpu.matmul %10, %12, %cst_9 {dimension_numbers = #tpu.dot_dimension_numbers<[1], [0], [0], [1], [0, 0, 1, 1], [], []>} : vector<8x512xbf16>, vector<512x128xbf16>, vector<8x128xf32> -> vector<8x128xf32>
    %14 = arith.addf %8, %13 : vector<8x128xf32>
    %15 = vector.extract_strided_slice %5 {offsets = [1, 0, 0], sizes = [1, 8, 512], strides = [1, 1, 1]} : vector<6x8x512xbf16> to vector<1x8x512xbf16>
    %16 = vector.shape_cast %15 : vector<1x8x512xbf16> to vector<8x512xbf16>
    %c1 = arith.constant 1 : index
    %c0_10 = arith.constant 0 : index
    %c0_11 = arith.constant 0 : index
    %17 = vector.load %arg3[%c1, %c0_10, %c0_11] : memref<6x512x128xbf16, #tpu.memory_space<vmem>>, vector<1x512x128xbf16>
    %18 = vector.shape_cast %17 : vector<1x512x128xbf16> to vector<512x128xbf16>
    %cst_12 = arith.constant dense<0.000000e+00> : vector<8x128xf32>
    %19 = tpu.matmul %16, %18, %cst_12 {dimension_numbers = #tpu.dot_dimension_numbers<[1], [0], [0], [1], [0, 0, 1, 1], [], []>} : vector<8x512xbf16>, vector<512x128xbf16>, vector<8x128xf32> -> vector<8x128xf32>
    %20 = arith.addf %14, %19 : vector<8x128xf32>
    %21 = vector.extract_strided_slice %5 {offsets = [2, 0, 0], sizes = [1, 8, 512], strides = [1, 1, 1]} : vector<6x8x512xbf16> to vector<1x8x512xbf16>
    %22 = vector.shape_cast %21 : vector<1x8x512xbf16> to vector<8x512xbf16>
    %c2 = arith.constant 2 : index
    %c0_13 = arith.constant 0 : index
    %c0_14 = arith.constant 0 : index
    %23 = vector.load %arg3[%c2, %c0_13, %c0_14] : memref<6x512x128xbf16, #tpu.memory_space<vmem>>, vector<1x512x128xbf16>
    %24 = vector.shape_cast %23 : vector<1x512x128xbf16> to vector<512x128xbf16>
    %cst_15 = arith.constant dense<0.000000e+00> : vector<8x128xf32>
    %25 = tpu.matmul %22, %24, %cst_15 {dimension_numbers = #tpu.dot_dimension_numbers<[1], [0], [0], [1], [0, 0, 1, 1], [], []>} : vector<8x512xbf16>, vector<512x128xbf16>, vector<8x128xf32> -> vector<8x128xf32>
    %26 = arith.addf %20, %25 : vector<8x128xf32>
    %27 = vector.extract_strided_slice %5 {offsets = [3, 0, 0], sizes = [1, 8, 512], strides = [1, 1, 1]} : vector<6x8x512xbf16> to vector<1x8x512xbf16>
    %28 = vector.shape_cast %27 : vector<1x8x512xbf16> to vector<8x512xbf16>
    %c3 = arith.constant 3 : index
    %c0_16 = arith.constant 0 : index
    %c0_17 = arith.constant 0 : index
    %29 = vector.load %arg3[%c3, %c0_16, %c0_17] : memref<6x512x128xbf16, #tpu.memory_space<vmem>>, vector<1x512x128xbf16>
    %30 = vector.shape_cast %29 : vector<1x512x128xbf16> to vector<512x128xbf16>
    %cst_18 = arith.constant dense<0.000000e+00> : vector<8x128xf32>
    %31 = tpu.matmul %28, %30, %cst_18 {dimension_numbers = #tpu.dot_dimension_numbers<[1], [0], [0], [1], [0, 0, 1, 1], [], []>} : vector<8x512xbf16>, vector<512x128xbf16>, vector<8x128xf32> -> vector<8x128xf32>
    %32 = arith.addf %26, %31 : vector<8x128xf32>
    %33 = vector.extract_strided_slice %5 {offsets = [4, 0, 0], sizes = [1, 8, 512], strides = [1, 1, 1]} : vector<6x8x512xbf16> to vector<1x8x512xbf16>
    %34 = vector.shape_cast %33 : vector<1x8x512xbf16> to vector<8x512xbf16>
    %c4 = arith.constant 4 : index
    %c0_19 = arith.constant 0 : index
    %c0_20 = arith.constant 0 : index
    %35 = vector.load %arg3[%c4, %c0_19, %c0_20] : memref<6x512x128xbf16, #tpu.memory_space<vmem>>, vector<1x512x128xbf16>
    %36 = vector.shape_cast %35 : vector<1x512x128xbf16> to vector<512x128xbf16>
    %cst_21 = arith.constant dense<0.000000e+00> : vector<8x128xf32>
    %37 = tpu.matmul %34, %36, %cst_21 {dimension_numbers = #tpu.dot_dimension_numbers<[1], [0], [0], [1], [0, 0, 1, 1], [], []>} : vector<8x512xbf16>, vector<512x128xbf16>, vector<8x128xf32> -> vector<8x128xf32>
    %38 = arith.addf %32, %37 : vector<8x128xf32>
    %39 = vector.extract_strided_slice %5 {offsets = [5, 0, 0], sizes = [1, 8, 512], strides = [1, 1, 1]} : vector<6x8x512xbf16> to vector<1x8x512xbf16>
    %40 = vector.shape_cast %39 : vector<1x8x512xbf16> to vector<8x512xbf16>
    %c5 = arith.constant 5 : index
    %c0_22 = arith.constant 0 : index
    %c0_23 = arith.constant 0 : index
    %41 = vector.load %arg3[%c5, %c0_22, %c0_23] : memref<6x512x128xbf16, #tpu.memory_space<vmem>>, vector<1x512x128xbf16>
    %42 = vector.shape_cast %41 : vector<1x512x128xbf16> to vector<512x128xbf16>
    %cst_24 = arith.constant dense<0.000000e+00> : vector<8x128xf32>
    %43 = tpu.matmul %40, %42, %cst_24 {dimension_numbers = #tpu.dot_dimension_numbers<[1], [0], [0], [1], [0, 0, 1, 1], [], []>} : vector<8x512xbf16>, vector<512x128xbf16>, vector<8x128xf32> -> vector<8x128xf32>
    %44 = arith.addf %38, %43 : vector<8x128xf32>
    %c0_25 = arith.constant 0 : index
    %c0_26 = arith.constant 0 : index
    %45 = vector.load %arg5[%c0_25, %c0_26] : memref<8x128xf32, #tpu.memory_space<vmem>>, vector<8x128xf32>
    tpu.vector_store %arg5[%c0_25, %c0_26], %44 {strides = array<i32>} : memref<8x128xf32, #tpu.memory_space<vmem>>, vector<8x128xf32>,
    return
  }
  func.func @transform_0(%arg0: i32) -> (i32, i32, i32) {
    %c0_i32 = arith.constant 0 : i32
    %c0_i32_0 = arith.constant 0 : i32
    %c0_i32_1 = arith.constant 0 : i32
    return %c0_i32, %arg0, %c0_i32_0 : i32, i32, i32
  }
  func.func @transform_1(%arg0: i32) -> (i32, i32) {
    %c0_i32 = arith.constant 0 : i32
    %c0_i32_0 = arith.constant 0 : i32
    %c0_i32_1 = arith.constant 0 : i32
    return %c0_i32, %c0_i32_0 : i32, i32
  }
  func.func @transform_2(%arg0: i32) -> (i32, i32, i32) {
    %c0_i32 = arith.constant 0 : i32
    %c0_i32_0 = arith.constant 0 : i32
    %c0_i32_1 = arith.constant 0 : i32
    %c0_i32_2 = arith.constant 0 : i32
    return %c0_i32, %c0_i32_0, %c0_i32_1 : i32, i32, i32
  }
  func.func @transform_3(%arg0: i32) -> (i32, i32) {
    %c0_i32 = arith.constant 0 : i32
    %c0_i32_0 = arith.constant 0 : i32
    %c0_i32_1 = arith.constant 0 : i32
    return %c0_i32, %c0_i32_0 : i32, i32
  }
  func.func @transform_4(%arg0: i32) -> (i32, i32) {
    %c0_i32 = arith.constant 0 : i32
    %c0_i32_0 = arith.constant 0 : i32
    return %arg0, %c0_i32 : i32, i32
  }
}

</mosaic_0001>

<bundles_post_ra>
// kernel: tpu_custom_call.1
= control target key start
LH: loop header
LB: loop body
LE: loop exit
PB: predicated region body
PF: predicated region fallthrough
CT: control target
= control target key end

     0   :  { %9 = vsyncpa [#allocation3], 0  ;;  %s5267_s0 = inlined_call_operand.hbm [shape: bf16[6,8,768], index: 0, kind: input, shape index: {}]   ;;  %s5268_s1 = inlined_call_operand.hbm [shape: bf16[768,512], index: 1, kind: input, shape index: {}]   ;;  %s5269_s2 = inlined_call_operand.hbm [shape: bf16[6,512,128], index: 2, kind: input, shape index: {}]   ;;  %s5270_s3 = inlined_call_operand.vmem [shape: f32[1,128], index: 3, kind: input, shape index: {}]   ;;  %s5271_s4 = inlined_call_operand.hbm [shape: f32[8,128], index: 4, kind: output, shape index: {}]  }
   0x1   :  { %10 = vsyncpa [#allocation6], 0 }
   0x2   :  { %11 = vsyncpa [#allocation4], 0  ;;  %s5047_s15 = smov [#allocation5]  }
   0x3   :  { %s29_s16 = sshll.u32 %s5047_s15, 4  ;;  %s30_s16 = int_to_ptr.vmem [resolvable:$true] %s29_s16 }
   0x4   :  { %s4969_s17 = scalar_lea.vmem %s30_s16, 24576  ;;  %p4974_p1 = scmp.lt.s32.totalorder %s30_s16, %s30_s16 }
   0x5   :  { %p4970_p0 = scmp.ne.s32.totalorder %s30_s16, %s4969_s17  ;;  %p4975_p2 = scmp.lt.s32.totalorder %s4969_s17, %s4969_s17 }
   0x7   :  { %p4976_p3 = por %p4975_p2, %p4974_p1 }
   0x9   :  { %p4977_p4 = pnand %p4976_p3, %p4970_p0 }
   0xb   :  { %4980 = shalt.err (!%p4977_p4)
}
   0xc   :  { %s5048_s18 = smov 256   ;;  %s5049_s19 = smov 16  }
   0xd   :  { %35 = dma.hbm_to_vmem [thread:$0]  %s5268_s1, 24576, %s30_s16, [#allocation6], %s5048_s18, %s5048_s18, %s5049_s19  }
   0xe   :  { %s5050_s22 = smov [#allocation2]  }
   0xf   :  { %s17_s23 = sshll.u32 %s5050_s22, 4  ;;  %s18_s23 = int_to_ptr.vmem [resolvable:$true] %s17_s23 }
  0x10   :  { %s4989_s24 = scalar_lea.vmem %s18_s23, 2304  ;;  %p4994_p6 = scmp.lt.s32.totalorder %s18_s23, %s18_s23 }
  0x11   :  { %p4990_p5 = scmp.ne.s32.totalorder %s18_s23, %s4989_s24  ;;  %p4995_p7 = scmp.lt.s32.totalorder %s4989_s24, %s4989_s24 }
  0x13   :  { %p4996_p8 = por %p4995_p7, %p4994_p6 }
  0x15   :  { %p4997_p9 = pnand %p4996_p8, %p4990_p5 }
  0x17   :  { %5000 = shalt.err (!%p4997_p9)
}
  0x18   :  { %s5051_s25 = smov 384   ;;  %s5052_s26 = smov 24  }
  0x19   :  { %23 = dma.hbm_to_vmem [thread:$0]  %s5267_s0, 2304, %s18_s23, [#allocation3], %s5051_s25, %s5051_s25, %s5052_s26  }
  0x1a   :  { %s5053_s29 = smov [#allocation7]  }
  0x1b   :  { %s41_s30 = sshll.u32 %s5053_s29, 4  ;;  %s42_s30 = int_to_ptr.vmem [resolvable:$true] %s41_s30 }
  0x1c   :  { %s5009_s1 = scalar_lea.vmem %s42_s30, 24576  ;;  %p5014_p11 = scmp.lt.s32.totalorder %s42_s30, %s42_s30 }
  0x1d   :  { %p5010_p10 = scmp.ne.s32.totalorder %s42_s30, %s5009_s1  ;;  %p5015_p12 = scmp.lt.s32.totalorder %s5009_s1, %s5009_s1 }
  0x1f   :  { %p5016_p13 = por %p5015_p12, %p5014_p11 }
  0x21   :  { %p5017_p0 = pnand %p5016_p13, %p5010_p10 }
  0x23   :  { %5020 = shalt.err (!%p5017_p0)
}
  0x24   :  { %s5054_s5 = smov 64   ;;  %s5055_s6 = smov 4  }
  0x25   :  { %47 = dma.hbm_to_vmem [thread:$0]  %s5269_s2, 24576, %s42_s30, [#allocation6], %s5054_s5, %s5054_s5, %s5055_s6  }
  0x26   :  { %5041 = dma.done.wait [#allocation3], 2304  }
  0x27   :  { %5042 = vsyncadd [#allocation3], 4294964992 }
  0x28   :  { %5043 = dma.done.wait [#allocation6], 49152  }
  0x29   :  { %5044 = vsyncadd [#allocation6], 4294918144  ;;  %v4450_v0 = vld [vmem:[#allocation5 + $0xe4] ss:$16 sps:$4 sm:$0xff]   ;;  %v4454_v2 = vld [vmem:[#allocation5 + $0xe0] ss:$16 sps:$4 sm:$0xff]  }
  0x2a   :  { %v4452_v1 = vld [vmem:[#allocation5 + $0x2e4] ss:$16 sps:$4 sm:$0xff]   ;;  %1320 = vmatprep.subr.bf16.mxu0 %v4450_v0  ;;  %v4455_v3 = vld [vmem:[#allocation5 + $0x2e0] ss:$16 sps:$4 sm:$0xff]  }
  0x2b   :  { %1383 = vmatprep.subr.bf16.mxu1 %v4452_v1  ;;  %v4456_v4 = vld [vmem:[#allocation5 + $0xc4] ss:$16 sps:$4 sm:$0xff]   ;;  %1321 = vmatpush1.bf16.msra.mxu0 %v4454_v2  ;;  %v4460_v6 = vld [vmem:[#allocation5 + $0xc0] ss:$16 sps:$4 sm:$0xff]  }
  0x2c   :  { %1384 = vmatpush1.bf16.msra.mxu1 %v4455_v3  ;;  %v4458_v5 = vld [vmem:[#allocation5 + $0x2c4] ss:$16 sps:$4 sm:$0xff]   ;;  %1322 = vmatprep.subr.bf16.mxu0 %v4456_v4  ;;  %v4461_v7 = vld [vmem:[#allocation5 + $0x2c0] ss:$16 sps:$4 sm:$0xff]   ;;  %v4557_v3 = vld [vmem:[#allocation5 + $0xec] ss:$16 sps:$4 sm:$0xff]  }
  0x2d   :  { %1385 = vmatprep.subr.bf16.mxu1 %v4458_v5  ;;  %v4462_v8 = vld [vmem:[#allocation5 + $0xa4] ss:$16 sps:$4 sm:$0xff]   ;;  %v4466_v10 = vld [vmem:[#allocation5 + $0xa0] ss:$16 sps:$4 sm:$0xff]  }
  0x2e   :  { %v4464_v9 = vld [vmem:[#allocation5 + $0x2a4] ss:$16 sps:$4 sm:$0xff]   ;;  %v4467_v11 = vld [vmem:[#allocation5 + $0x2a0] ss:$16 sps:$4 sm:$0xff]  }
  0x2f   :  { %1323 = vmatpush1.bf16.msra.mxu0 %v4460_v6  ;;  %v4468_v12 = vld [vmem:[#allocation5 + $0x84] ss:$16 sps:$4 sm:$0xff]   ;;  %v4472_v14 = vld [vmem:[#allocation5 + $0x80] ss:$16 sps:$4 sm:$0xff]  }
  0x30   :  { %1386 = vmatpush1.bf16.msra.mxu1 %v4461_v7  ;;  %1324 = vmatprep.subr.bf16.mxu0 %v4462_v8  ;;  %v4470_v13 = vld [vmem:[#allocation5 + $0x284] ss:$16 sps:$4 sm:$0xff]   ;;  %v4473_v15 = vld [vmem:[#allocation5 + $0x280] ss:$16 sps:$4 sm:$0xff]   ;;  %v4555_v7 = vld [vmem:[#allocation5 + $0xe8] ss:$16 sps:$4 sm:$0xff]  }
  0x31   :  { %1387 = vmatprep.subr.bf16.mxu1 %v4464_v9  ;;  %v4474_v16 = vld [vmem:[#allocation5 + $0x64] ss:$16 sps:$4 sm:$0xff]   ;;  %v4478_v18 = vld [vmem:[#allocation5 + $0x60] ss:$16 sps:$4 sm:$0xff]   ;;  %v4563_v9 = vld [vmem:[#allocation5 + $0xcc] ss:$16 sps:$4 sm:$0xff]  }
  0x32   :  { %v4476_v17 = vld [vmem:[#allocation5 + $0x264] ss:$16 sps:$4 sm:$0xff]   ;;  %v4479_v19 = vld [vmem:[#allocation5 + $0x260] ss:$16 sps:$4 sm:$0xff]  }
  0x33   :  { %1325 = vmatpush1.bf16.msra.mxu0 %v4466_v10  ;;  %v4480_v20 = vld [vmem:[#allocation5 + $0x44] ss:$16 sps:$4 sm:$0xff]   ;;  %v4484_v22 = vld [vmem:[#allocation5 + $0x40] ss:$16 sps:$4 sm:$0xff]  }
  0x34   :  { %1388 = vmatpush1.bf16.msra.mxu1 %v4467_v11  ;;  %1326 = vmatprep.subr.bf16.mxu0 %v4468_v12  ;;  %v4482_v21 = vld [vmem:[#allocation5 + $0x244] ss:$16 sps:$4 sm:$0xff]   ;;  %v4485_v23 = vld [vmem:[#allocation5 + $0x240] ss:$16 sps:$4 sm:$0xff]   ;;  %v4561_v11 = vld [vmem:[#allocation5 + $0xc8] ss:$16 sps:$4 sm:$0xff]  }
  0x35   :  { %1389 = vmatprep.subr.bf16.mxu1 %v4470_v13  ;;  %v4486_v24 = vld [vmem:[#allocation5 + $0x24] ss:$16 sps:$4 sm:$0xff]   ;;  %v4490_v26 = vld [vmem:[#allocation5 + $0x20] ss:$16 sps:$4 sm:$0xff]   ;;  %v4569_v13 = vld [vmem:[#allocation5 + $0xac] ss:$16 sps:$4 sm:$0xff]  }
  0x36   :  { %v4488_v25 = vld [vmem:[#allocation5 + $0x224] ss:$16 sps:$4 sm:$0xff]   ;;  %v4491_v27 = vld [vmem:[#allocation5 + $0x220] ss:$16 sps:$4 sm:$0xff]  }
  0x37   :  { %1327 = vmatpush1.bf16.msra.mxu0 %v4472_v14  ;;  %v4492_v28 = vld [vmem:[#allocation5 + $0x4] ss:$16 sps:$4 sm:$0xff]   ;;  %v4496_v30 = vld [vmem:[#allocation5] ss:$16 sps:$4 sm:$0xff]  }
  0x38   :  { %1390 = vmatpush1.bf16.msra.mxu1 %v4473_v15  ;;  %1328 = vmatprep.subr.bf16.mxu0 %v4474_v16  ;;  %v4494_v29 = vld [vmem:[#allocation5 + $0x204] ss:$16 sps:$4 sm:$0xff]   ;;  %v4497_v31 = vld [vmem:[#allocation5 + $0x200] ss:$16 sps:$4 sm:$0xff]   ;;  %v4567_v15 = vld [vmem:[#allocation5 + $0xa8] ss:$16 sps:$4 sm:$0xff]  }
  0x39   :  { %1391 = vmatprep.subr.bf16.mxu1 %v4476_v17  ;;  %v4498_v32 = vld [vmem:[#allocation5 + $0x1e4] ss:$16 sps:$4 sm:$0xff]   ;;  %v4502_v34 = vld [vmem:[#allocation5 + $0x1e0] ss:$16 sps:$4 sm:$0xff]   ;;  %v4575_v17 = vld [vmem:[#allocation5 + $0x8c] ss:$16 sps:$4 sm:$0xff]  }
  0x3a   :  { %v4500_v33 = vld [vmem:[#allocation5 + $0x3e4] ss:$16 sps:$4 sm:$0xff]   ;;  %v4503_v35 = vld [vmem:[#allocation5 + $0x3e0] ss:$16 sps:$4 sm:$0xff]  }
  0x3b   :  { %1329 = vmatpush1.bf16.msra.mxu0 %v4478_v18  ;;  %v4504_v36 = vld [vmem:[#allocation5 + $0x1c4] ss:$16 sps:$4 sm:$0xff]   ;;  %v4508_v38 = vld [vmem:[#allocation5 + $0x1c0] ss:$16 sps:$4 sm:$0xff]  }
  0x3c   :  { %1392 = vmatpush1.bf16.msra.mxu1 %v4479_v19  ;;  %1330 = vmatprep.subr.bf16.mxu0 %v4480_v20  ;;  %v4506_v37 = vld [vmem:[#allocation5 + $0x3c4] ss:$16 sps:$4 sm:$0xff]   ;;  %v4509_v39 = vld [vmem:[#allocation5 + $0x3c0] ss:$16 sps:$4 sm:$0xff]   ;;  %v4573_v19 = vld [vmem:[#allocation5 + $0x88] ss:$16 sps:$4 sm:$0xff]  }
  0x3d   :  { %1393 = vmatprep.subr.bf16.mxu1 %v4482_v21  ;;  %v4510_v40 = vld [vmem:[#allocation5 + $0x1a4] ss:$16 sps:$4 sm:$0xff]   ;;  %v4514_v42 = vld [vmem:[#allocation5 + $0x1a0] ss:$16 sps:$4 sm:$0xff]   ;;  %v4581_v21 = vld [vmem:[#allocation5 + $0x6c] ss:$16 sps:$4 sm:$0xff]  }
  0x3e   :  { %v4512_v41 = vld [vmem:[#allocation5 + $0x3a4] ss:$16 sps:$4 sm:$0xff]   ;;  %v4515_v43 = vld [vmem:[#allocation5 + $0x3a0] ss:$16 sps:$4 sm:$0xff]  }
  0x3f   :  { %1331 = vmatpush1.bf16.msra.mxu0 %v4484_v22  ;;  %v4516_v44 = vld [vmem:[#allocation5 + $0x184] ss:$16 sps:$4 sm:$0xff]   ;;  %v4520_v46 = vld [vmem:[#allocation5 + $0x180] ss:$16 sps:$4 sm:$0xff]  }
  0x40   :  { %1394 = vmatpush1.bf16.msra.mxu1 %v4485_v23  ;;  %1332 = vmatprep.subr.bf16.mxu0 %v4486_v24  ;;  %v4518_v45 = vld [vmem:[#allocation5 + $0x384] ss:$16 sps:$4 sm:$0xff]   ;;  %v4521_v47 = vld [vmem:[#allocation5 + $0x380] ss:$16 sps:$4 sm:$0xff]  }
  0x41   :  { %1395 = vmatprep.subr.bf16.mxu1 %v4488_v25  ;;  %v4522_v48 = vld [vmem:[#allocation5 + $0x164] ss:$16 sps:$4 sm:$0xff]   ;;  %v4526_v52 = vld [vmem:[#allocation5 + $0x160] ss:$16 sps:$4 sm:$0xff]  }
  0x42   :  { %v5091_v49 = vld [vmem:[#allocation2 + $0x4] ss:$24 sps:$4 sm:$0xff]   ;;  %v4527_v53 = vld [vmem:[#allocation5 + $0x360] ss:$16 sps:$4 sm:$0xff]   ;;  %v5100_v22 = vld [vmem:[#allocation2 + $0x34] ss:$24 sps:$4 sm:$0xff]  }
  0x43   :  { %1333 = vmatpush1.bf16.msra.mxu0 %v4490_v26  ;;  %v4524_v50 = vld [vmem:[#allocation5 + $0x364] ss:$16 sps:$4 sm:$0xff]   ;;  %1352 = vmatprep.mubr.bf16.mxu0 %v5091_v49  ;;  %v4532_v56 = vld [vmem:[#allocation5 + $0x140] ss:$16 sps:$4 sm:$0xff]  }
  0x44   :  { %1396 = vmatpush1.bf16.msra.mxu1 %v4491_v27  ;;  %1334 = vmatprep.subr.bf16.mxu0 %v4492_v28  ;;  %v5093_v51 = vld [vmem:[#allocation2 + $0xc] ss:$24 sps:$4 sm:$0xff]   ;;  %v4533_v57 = vld [vmem:[#allocation5 + $0x340] ss:$16 sps:$4 sm:$0xff]   ;;  %v4620_v23 = vld [vmem:[#allocation2 + $0x3c] ss:$24 sps:$4 sm:$0xff]  }
  0x45   :  { %1397 = vmatprep.subr.bf16.mxu1 %v4494_v29  ;;  %1415 = vmatprep.mubr.bf16.mxu1 %v5093_v51  ;;  %v4528_v54 = vld [vmem:[#allocation5 + $0x144] ss:$16 sps:$4 sm:$0xff]   ;;  %v4538_v60 = vld [vmem:[#allocation5 + $0x120] ss:$16 sps:$4 sm:$0xff]   ;;  %v4579_v27 = vld [vmem:[#allocation5 + $0x68] ss:$16 sps:$4 sm:$0xff]  }
  0x46   :  { %v4530_v55 = vld [vmem:[#allocation5 + $0x344] ss:$16 sps:$4 sm:$0xff]   ;;  %v4539_v61 = vld [vmem:[#allocation5 + $0x320] ss:$16 sps:$4 sm:$0xff]   ;;  %v4587_v29 = vld [vmem:[#allocation5 + $0x4c] ss:$16 sps:$4 sm:$0xff]  }
  0x47   :  { %1335 = vmatpush1.bf16.msra.mxu0 %v4496_v30  ;;  %v4534_v58 = vld [vmem:[#allocation5 + $0x124] ss:$16 sps:$4 sm:$0xff]   ;;  %v4544_v0 = vld [vmem:[#allocation5 + $0x100] ss:$16 sps:$4 sm:$0xff]  }
  0x48   :  { %1398 = vmatpush1.bf16.msra.mxu1 %v4497_v31  ;;  %1336 = vmatprep.subr.bf16.mxu0 %v4498_v32  ;;  %v4536_v59 = vld [vmem:[#allocation5 + $0x324] ss:$16 sps:$4 sm:$0xff]   ;;  %v4545_v1 = vld [vmem:[#allocation5 + $0x300] ss:$16 sps:$4 sm:$0xff]   ;;  %v4585_v31 = vld [vmem:[#allocation5 + $0x48] ss:$16 sps:$4 sm:$0xff]  }
  0x49   :  { %1399 = vmatprep.subr.bf16.mxu1 %v4500_v33  ;;  %v4540_v62 = vld [vmem:[#allocation5 + $0x104] ss:$16 sps:$4 sm:$0xff]   ;;  %v5097_v4 = vld [vmem:[#allocation2] ss:$24 sps:$4 sm:$0xff]   ;;  %v5102_v24 = vld [vmem:[#allocation2 + $0x30] ss:$24 sps:$4 sm:$0xff]  }
  0x4a   :  { %v4542_v63 = vld [vmem:[#allocation5 + $0x304] ss:$16 sps:$4 sm:$0xff]   ;;  %v4549_v5 = vld [vmem:[#allocation2 + $0x8] ss:$24 sps:$4 sm:$0xff]   ;;  %v4623_v25 = vld [vmem:[#allocation2 + $0x38] ss:$24 sps:$4 sm:$0xff]  }
  0x4b   :  { %1337 = vmatpush2.bf16.msra.mxu0 %v4502_v34  ;;  %v4554_v2 = vld [vmem:[#allocation5 + $0x4e4] ss:$16 sps:$4 sm:$0xff]   ;;  %v4552_v6 = vld [vmem:[#allocation5 + $0x4e0] ss:$16 sps:$4 sm:$0xff]   ;;  %v4593_v33 = vld [vmem:[#allocation5 + $0x2c] ss:$16 sps:$4 sm:$0xff]  }
  0x4c   :  { %1400 = vmatpush2.bf16.msra.mxu1 %v4503_v35  ;;  %1338 = vmatprep.subr.bf16.mxu0 %v4504_v36  ;;  %v4560_v8 = vld [vmem:[#allocation5 + $0x4c4] ss:$16 sps:$4 sm:$0xff]   ;;  %v4558_v10 = vld [vmem:[#allocation5 + $0x4c0] ss:$16 sps:$4 sm:$0xff]  }
  0x4d   :  { %1401 = vmatprep.subr.bf16.mxu1 %v4506_v37  ;;  %v4566_v12 = vld [vmem:[#allocation5 + $0x4a4] ss:$16 sps:$4 sm:$0xff]   ;;  %v4564_v14 = vld [vmem:[#allocation5 + $0x4a0] ss:$16 sps:$4 sm:$0xff]  }
  0x4e   :  { %v4572_v16 = vld [vmem:[#allocation5 + $0x484] ss:$16 sps:$4 sm:$0xff]   ;;  %v4570_v18 = vld [vmem:[#allocation5 + $0x480] ss:$16 sps:$4 sm:$0xff]  }
  0x4f   :  { %1339 = vmatpush2.bf16.msra.mxu0 %v4508_v38  ;;  %v4578_v20 = vld [vmem:[#allocation5 + $0x464] ss:$16 sps:$4 sm:$0xff]   ;;  %v4576_v26 = vld [vmem:[#allocation5 + $0x460] ss:$16 sps:$4 sm:$0xff]  }
  0x50   :  { %1402 = vmatpush2.bf16.msra.mxu1 %v4509_v39  ;;  %1340 = vmatprep.subr.bf16.mxu0 %v4510_v40  ;;  %v4584_v28 = vld [vmem:[#allocation5 + $0x444] ss:$16 sps:$4 sm:$0xff]   ;;  %v4582_v30 = vld [vmem:[#allocation5 + $0x440] ss:$16 sps:$4 sm:$0xff]   ;;  %v4591_v39 = vld [vmem:[#allocation5 + $0x28] ss:$16 sps:$4 sm:$0xff]  }
  0x51   :  { %1403 = vmatprep.subr.bf16.mxu1 %v4512_v41  ;;  %v4590_v32 = vld [vmem:[#allocation5 + $0x424] ss:$16 sps:$4 sm:$0xff]   ;;  %v5110_v36 = vld [vmem:[#allocation2 + $0x60] ss:$24 sps:$4 sm:$0xff]   ;;  %v4599_v41 = vld [vmem:[#allocation5 + $0xc] ss:$16 sps:$4 sm:$0xff]  }
  0x52   :  { %v5106_v34 = vld [vmem:[#allocation2 + $0x64] ss:$24 sps:$4 sm:$0xff]   ;;  %v4641_v37 = vld [vmem:[#allocation2 + $0x68] ss:$24 sps:$4 sm:$0xff]  }
  0x53   :  { %1341 = vmatpush2.bf16.msra.mxu0 %v4514_v42  ;;  %v5108_v35 = vld [vmem:[#allocation2 + $0x6c] ss:$24 sps:$4 sm:$0xff]   ;;  %v4588_v38 = vld [vmem:[#allocation5 + $0x420] ss:$16 sps:$4 sm:$0xff]  }
  0x54   :  { %1404 = vmatpush2.bf16.msra.mxu1 %v4515_v43  ;;  %1342 = vmatprep.subr.bf16.mxu0 %v4516_v44  ;;  %v4596_v40 = vld [vmem:[#allocation5 + $0x404] ss:$16 sps:$4 sm:$0xff]   ;;  %v4594_v42 = vld [vmem:[#allocation5 + $0x400] ss:$16 sps:$4 sm:$0xff]   ;;  %v4597_v43 = vld [vmem:[#allocation5 + $0x8] ss:$16 sps:$4 sm:$0xff]  }
  0x55   :  { %1405 = vmatprep.subr.bf16.mxu1 %v4518_v45  ;;  %v4602_v44 = vld [vmem:[#allocation5 + $0x5e4] ss:$16 sps:$4 sm:$0xff]   ;;  %v4605_v45 = vld [vmem:[#allocation5 + $0x1ec] ss:$16 sps:$4 sm:$0xff]  }
  0x57   :  { %1343 = vmatpush2.bf16.msra.mxu0 %v4520_v46  ;;  %v5116_v46 = vld [vmem:[#allocation2 + $0x14] ss:$24 sps:$4 sm:$0xff]  }
  0x58   :  { %1406 = vmatpush2.bf16.msra.mxu1 %v4521_v47  ;;  %1344 = vmatprep.subr.bf16.mxu0 %v4522_v48  ;;  %v4600_v47 = vld [vmem:[#allocation5 + $0x5e0] ss:$16 sps:$4 sm:$0xff]   ;;  %v4603_v48 = vld [vmem:[#allocation5 + $0x1e8] ss:$16 sps:$4 sm:$0xff]  }
  0x59   :  { %1407 = vmatprep.subr.bf16.mxu1 %v4524_v50  ;;  %v4608_v50 = vld [vmem:[#allocation5 + $0x5c4] ss:$16 sps:$4 sm:$0xff]  }
  0x5b   :  { %1345 = vmatpush2.bf16.msra.mxu0 %v4526_v52  ;;  %v4611_v52 = vld [vmem:[#allocation5 + $0x1cc] ss:$16 sps:$4 sm:$0xff]  }
  0x5c   :  { %1408 = vmatpush2.bf16.msra.mxu1 %v4527_v53  ;;  %1346 = vmatprep.subr.bf16.mxu0 %v4528_v54  ;;  %v4609_v53 = vld [vmem:[#allocation5 + $0x1c8] ss:$16 sps:$4 sm:$0xff]   ;;  %v4614_v54 = vld [vmem:[#allocation5 + $0x5a4] ss:$16 sps:$4 sm:$0xff]  }
  0x5d   :  { %1409 = vmatprep.subr.bf16.mxu1 %v4530_v55  ;;  %v4617_v55 = vld [vmem:[#allocation5 + $0x1ac] ss:$16 sps:$4 sm:$0xff]  }
  0x5f   :  { %1347 = vmatpush2.bf16.msra.mxu0 %v4532_v56  ;;  %v4612_v56 = vld [vmem:[#allocation5 + $0x5a0] ss:$16 sps:$4 sm:$0xff]  }
  0x60   :  { %1410 = vmatpush2.bf16.msra.mxu1 %v4533_v57  ;;  %1348 = vmatprep.subr.bf16.mxu0 %v4534_v58  ;;  %v4615_v57 = vld [vmem:[#allocation5 + $0x1a8] ss:$16 sps:$4 sm:$0xff]   ;;  %v4626_v58 = vld [vmem:[#allocation5 + $0x584] ss:$16 sps:$4 sm:$0xff]  }
  0x61   :  { %1411 = vmatprep.subr.bf16.mxu1 %v4536_v59  ;;  %v4629_v59 = vld [vmem:[#allocation5 + $0x18c] ss:$16 sps:$4 sm:$0xff]  }
  0x63   :  { %1349 = vmatpush2.bf16.msra.mxu0 %v4538_v60  ;;  %v4624_v60 = vld [vmem:[#allocation5 + $0x580] ss:$16 sps:$4 sm:$0xff]  }
  0x64   :  { %1412 = vmatpush2.bf16.msra.mxu1 %v4539_v61  ;;  %1350 = vmatprep.subr.bf16.mxu0 %v4540_v62  ;;  %v4627_v61 = vld [vmem:[#allocation5 + $0x188] ss:$16 sps:$4 sm:$0xff]   ;;  %v4632_v62 = vld [vmem:[#allocation5 + $0x564] ss:$16 sps:$4 sm:$0xff]  }
  0x65   :  { %1413 = vmatprep.subr.bf16.mxu1 %v4542_v63  ;;  %v4635_v63 = vld [vmem:[#allocation5 + $0x16c] ss:$16 sps:$4 sm:$0xff]  }
  0x67   :  { %1351 = vmatpush2.bf16.msra.mxu0 %v4544_v0  ;;  %v4630_v0 = vld [vmem:[#allocation5 + $0x560] ss:$16 sps:$4 sm:$0xff]  }
  0x68   :  { %1414 = vmatpush2.bf16.msra.mxu1 %v4545_v1  ;;  %1446 = vmatprep.subr.bf16.mxu0 %v4554_v2  ;;  %v4633_v1 = vld [vmem:[#allocation5 + $0x168] ss:$16 sps:$4 sm:$0xff]   ;;  %v4644_v2 = vld [vmem:[#allocation5 + $0x544] ss:$16 sps:$4 sm:$0xff]  }
  0x69   :  { %1509 = vmatprep.subr.bf16.mxu1 %v4557_v3  ;;  %v4647_v3 = vld [vmem:[#allocation5 + $0x14c] ss:$16 sps:$4 sm:$0xff]  }
  0x6a   :  { %1353 = vmatmul.mubr.bf16.vlgmr.msra.gmra.mxu0 %v5097_v4 }
  0x6b   :  { %1416 = vmatmul.mubr.bf16.vlgmr.msra.gmra.mxu1 %v4549_v5  ;;  %1447 = vmatpush1.bf16.msra.mxu0 %v4552_v6  ;;  %v4642_v5 = vld [vmem:[#allocation5 + $0x540] ss:$16 sps:$4 sm:$0xff]   ;;  %v4645_v6 = vld [vmem:[#allocation5 + $0x148] ss:$16 sps:$4 sm:$0xff]  }
  0x6c   :  { %1510 = vmatpush1.bf16.msra.mxu1 %v4555_v7  ;;  %1448 = vmatprep.subr.bf16.mxu0 %v4560_v8  ;;  %v4650_v7 = vld [vmem:[#allocation5 + $0x524] ss:$16 sps:$4 sm:$0xff]   ;;  %v4653_v8 = vld [vmem:[#allocation5 + $0x12c] ss:$16 sps:$4 sm:$0xff]  }
  0x6d   :  { %1511 = vmatprep.subr.bf16.mxu1 %v4563_v9  ;;  %1362 = vmatprep.mubr.bf16.mxu0 %v5100_v22  ;;  %v4648_v9 = vld [vmem:[#allocation5 + $0x520] ss:$16 sps:$4 sm:$0xff]  }
  0x6e   :  { %1425 = vmatprep.mubr.bf16.mxu1 %v4620_v23  ;;  %v5121_v23 = vld [vmem:[#allocation2 + $0x44] ss:$24 sps:$4 sm:$0xff]  }
  0x6f   :  { %1449 = vmatpush1.bf16.msra.mxu0 %v4558_v10  ;;  %v4651_v10 = vld [vmem:[#allocation5 + $0x128] ss:$16 sps:$4 sm:$0xff]  }
  0x70   :  { %1512 = vmatpush1.bf16.msra.mxu1 %v4561_v11  ;;  %1450 = vmatprep.subr.bf16.mxu0 %v4566_v12  ;;  %v4656_v11 = vld [vmem:[#allocation5 + $0x504] ss:$16 sps:$4 sm:$0xff]   ;;  %v4659_v12 = vld [vmem:[#allocation5 + $0x10c] ss:$16 sps:$4 sm:$0xff]  }
  0x71   :  { %1513 = vmatprep.subr.bf16.mxu1 %v4569_v13  ;;  %v4654_v13 = vld [vmem:[#allocation5 + $0x500] ss:$16 sps:$4 sm:$0xff]  }
  0x72   :  { %1363 = vmatmul.mubr.bf16.gmra.mxu0 %v5102_v24 }
  0x73   :  { %1451 = vmatpush1.bf16.msra.mxu0 %v4564_v14  ;;  %1426 = vmatmul.mubr.bf16.gmra.mxu1 %v4623_v25  ;;  %v4657_v14 = vld [vmem:[#allocation5 + $0x108] ss:$16 sps:$4 sm:$0xff]  }
  0x74   :  { %1514 = vmatpush1.bf16.msra.mxu1 %v4567_v15  ;;  %1452 = vmatprep.subr.bf16.mxu0 %v4572_v16  ;;  %v4665_v15 = vld [vmem:[#allocation5 + $0x2ec] ss:$16 sps:$4 sm:$0xff]   ;;  %v4669_v25 = vld [vmem:[#allocation5 + $0x2c8] ss:$16 sps:$4 sm:$0xff]  }
  0x75   :  { %1515 = vmatprep.subr.bf16.mxu1 %v4575_v17  ;;  %1372 = vmatprep.mubr.bf16.mxu0 %v5106_v34  ;;  %v4668_v16 = vld [vmem:[#allocation5 + $0x4ec] ss:$16 sps:$4 sm:$0xff]   ;;  %v5119_v17 = vld [vmem:[#allocation2 + $0x10] ss:$24 sps:$4 sm:$0xff]  }
  0x76   :  { %1435 = vmatprep.mubr.bf16.mxu1 %v5108_v35 }
  0x77   :  { %1453 = vmatpush1.bf16.msra.mxu0 %v4570_v18  ;;  %v4663_v18 = vld [vmem:[#allocation5 + $0x2e8] ss:$16 sps:$4 sm:$0xff]  }
  0x78   :  { %1516 = vmatpush1.bf16.msra.mxu1 %v4573_v19  ;;  %1454 = vmatprep.subr.bf16.mxu0 %v4578_v20  ;;  %v4666_v19 = vld [vmem:[#allocation5 + $0x4e8] ss:$16 sps:$4 sm:$0xff]   ;;  %v4671_v20 = vld [vmem:[#allocation5 + $0x2cc] ss:$16 sps:$4 sm:$0xff]  }
  0x79   :  { %1517 = vmatprep.subr.bf16.mxu1 %v4581_v21  ;;  %v4674_v21 = vld [vmem:[#allocation5 + $0x4cc] ss:$16 sps:$4 sm:$0xff]  }
  0x7a   :  { %1373 = vmatmul.mubr.bf16.gmra.mxu0 %v5110_v36 }
  0x7b   :  { %1455 = vmatpush1.bf16.msra.mxu0 %v4576_v26  ;;  %1436 = vmatmul.mubr.bf16.gmra.mxu1 %v4641_v37  ;;  %v4672_v26 = vld [vmem:[#allocation5 + $0x4c8] ss:$16 sps:$4 sm:$0xff]  }
  0x7c   :  { %1518 = vmatpush1.bf16.msra.mxu1 %v4579_v27  ;;  %1456 = vmatprep.subr.bf16.mxu0 %v4584_v28  ;;  %v4680_v27 = vld [vmem:[#allocation5 + $0x2ac] ss:$16 sps:$4 sm:$0xff]   ;;  %v4684_v37 = vld [vmem:[#allocation5 + $0x288] ss:$16 sps:$4 sm:$0xff]  }
  0x7d   :  { %1519 = vmatprep.subr.bf16.mxu1 %v4587_v29  ;;  %1541 = vmatprep.mubr.bf16.mxu1 %v5091_v49  ;;  %v4606_v49 = vld [vmem:[#allocation5 + $0x5c0] ss:$16 sps:$4 sm:$0xff]   ;;  %v4683_v28 = vld [vmem:[#allocation5 + $0x4ac] ss:$16 sps:$4 sm:$0xff]  }
  0x7e   :  { %1478 = vmatprep.mubr.bf16.mxu0 %v5116_v46  ;;  %v5126_v29 = vld [vmem:[#allocation2 + $0x40] ss:$24 sps:$4 sm:$0xff]  }
  0x7f   :  { %1457 = vmatpush1.bf16.msra.mxu0 %v4582_v30  ;;  %v4678_v30 = vld [vmem:[#allocation5 + $0x2a8] ss:$16 sps:$4 sm:$0xff]  }
  0x80   :  { %1520 = vmatpush1.bf16.msra.mxu1 %v4585_v31  ;;  %1458 = vmatprep.subr.bf16.mxu0 %v4590_v32  ;;  %v4681_v31 = vld [vmem:[#allocation5 + $0x4a8] ss:$16 sps:$4 sm:$0xff]   ;;  %v4686_v32 = vld [vmem:[#allocation5 + $0x28c] ss:$16 sps:$4 sm:$0xff]  }
  0x81   :  { %1521 = vmatprep.subr.bf16.mxu1 %v4593_v33  ;;  %v5129_v33 = vld [vmem:[#allocation2 + $0x74] ss:$24 sps:$4 sm:$0xff]  }
  0x83   :  { %1459 = vmatpush1.bf16.msra.mxu0 %v4588_v38  ;;  %v4687_v38 = vld [vmem:[#allocation5 + $0x488] ss:$16 sps:$4 sm:$0xff]  }
  0x84   :  { %1522 = vmatpush1.bf16.msra.mxu1 %v4591_v39  ;;  %1460 = vmatprep.subr.bf16.mxu0 %v4596_v40  ;;  %v4695_v39 = vld [vmem:[#allocation5 + $0x26c] ss:$16 sps:$4 sm:$0xff]  }
  0x85   :  { %1523 = vmatprep.subr.bf16.mxu1 %v4599_v41  ;;  %v4698_v40 = vld [vmem:[#allocation5 + $0x46c] ss:$16 sps:$4 sm:$0xff]   ;;  %v4693_v41 = vld [vmem:[#allocation5 + $0x268] ss:$16 sps:$4 sm:$0xff]  }
  0x87   :  { %1461 = vmatpush1.bf16.msra.mxu0 %v4594_v42  ;;  %v4696_v42 = vld [vmem:[#allocation5 + $0x468] ss:$16 sps:$4 sm:$0xff]  }
  0x88   :  { %1524 = vmatpush1.bf16.msra.mxu1 %v4597_v43  ;;  %1462 = vmatprep.subr.bf16.mxu0 %v4602_v44  ;;  %v4701_v43 = vld [vmem:[#allocation5 + $0x24c] ss:$16 sps:$4 sm:$0xff]  }
  0x89   :  { %1525 = vmatprep.subr.bf16.mxu1 %v4605_v45  ;;  %v4704_v44 = vld [vmem:[#allocation5 + $0x44c] ss:$16 sps:$4 sm:$0xff]   ;;  %v4702_v45 = vld [vmem:[#allocation5 + $0x448] ss:$16 sps:$4 sm:$0xff]  }
  0x8b   :  { %1463 = vmatpush2.bf16.msra.mxu0 %v4600_v47  ;;  %v4707_v47 = vld [vmem:[#allocation5 + $0x22c] ss:$16 sps:$4 sm:$0xff]  }
  0x8c   :  { %1526 = vmatpush2.bf16.msra.mxu1 %v4603_v48  ;;  %1464 = vmatprep.subr.bf16.mxu0 %v4608_v50  ;;  %v4710_v48 = vld [vmem:[#allocation5 + $0x42c] ss:$16 sps:$4 sm:$0xff]   ;;  %v4705_v50 = vld [vmem:[#allocation5 + $0x228] ss:$16 sps:$4 sm:$0xff]  }
  0x8d   :  { %1527 = vmatprep.subr.bf16.mxu1 %v4611_v52  ;;  %v4713_v52 = vld [vmem:[#allocation5 + $0x20c] ss:$16 sps:$4 sm:$0xff]  }
  0x8f   :  { %1465 = vmatpush2.bf16.msra.mxu0 %v4606_v49  ;;  %v4716_v49 = vld [vmem:[#allocation5 + $0x40c] ss:$16 sps:$4 sm:$0xff]  }
  0x90   :  { %1528 = vmatpush2.bf16.msra.mxu1 %v4609_v53  ;;  %1466 = vmatprep.subr.bf16.mxu0 %v4614_v54  ;;  %v4711_v53 = vld [vmem:[#allocation5 + $0x208] ss:$16 sps:$4 sm:$0xff]   ;;  %v4719_v54 = vld [vmem:[#allocation5 + $0x3ec] ss:$16 sps:$4 sm:$0xff]  }
  0x91   :  { %1529 = vmatprep.subr.bf16.mxu1 %v4617_v55  ;;  %v4722_v55 = vld [vmem:[#allocation5 + $0x5ec] ss:$16 sps:$4 sm:$0xff]  }
  0x93   :  { %1467 = vmatpush2.bf16.msra.mxu0 %v4612_v56  ;;  %v4717_v56 = vld [vmem:[#allocation5 + $0x3e8] ss:$16 sps:$4 sm:$0xff]  }
  0x94   :  { %1530 = vmatpush2.bf16.msra.mxu1 %v4615_v57  ;;  %1468 = vmatprep.subr.bf16.mxu0 %v4626_v58  ;;  %v4720_v57 = vld [vmem:[#allocation5 + $0x5e8] ss:$16 sps:$4 sm:$0xff]   ;;  %v4725_v58 = vld [vmem:[#allocation5 + $0x3cc] ss:$16 sps:$4 sm:$0xff]  }
  0x95   :  { %1531 = vmatprep.subr.bf16.mxu1 %v4629_v59  ;;  %v4726_v59 = vld [vmem:[#allocation5 + $0x5c8] ss:$16 sps:$4 sm:$0xff]  }
  0x97   :  { %1469 = vmatpush2.bf16.msra.mxu0 %v4624_v60  ;;  %v4731_v60 = vld [vmem:[#allocation5 + $0x3ac] ss:$16 sps:$4 sm:$0xff]  }
  0x98   :  { %1532 = vmatpush2.bf16.msra.mxu1 %v4627_v61  ;;  %1470 = vmatprep.subr.bf16.mxu0 %v4632_v62  ;;  %v4734_v61 = vld [vmem:[#allocation5 + $0x5ac] ss:$16 sps:$4 sm:$0xff]   ;;  %v4729_v62 = vld [vmem:[#allocation5 + $0x3a8] ss:$16 sps:$4 sm:$0xff]  }
  0x99   :  { %1533 = vmatprep.subr.bf16.mxu1 %v4635_v63  ;;  %v4732_v63 = vld [vmem:[#allocation5 + $0x5a8] ss:$16 sps:$4 sm:$0xff]  }
  0x9b   :  { %1471 = vmatpush2.bf16.msra.mxu0 %v4630_v0  ;;  %v4737_v0 = vld [vmem:[#allocation5 + $0x38c] ss:$16 sps:$4 sm:$0xff]  }
  0x9c   :  { %1534 = vmatpush2.bf16.msra.mxu1 %v4633_v1  ;;  %1472 = vmatprep.subr.bf16.mxu0 %v4644_v2  ;;  %v4740_v1 = vld [vmem:[#allocation5 + $0x58c] ss:$16 sps:$4 sm:$0xff]   ;;  %v4735_v2 = vld [vmem:[#allocation5 + $0x388] ss:$16 sps:$4 sm:$0xff]  }
  0x9d   :  { %1535 = vmatprep.subr.bf16.mxu1 %v4647_v3  ;;  %v4738_v3 = vld [vmem:[#allocation5 + $0x588] ss:$16 sps:$4 sm:$0xff]  }
  0x9f   :  { %1473 = vmatpush2.bf16.msra.mxu0 %v4642_v5  ;;  %v4743_v5 = vld [vmem:[#allocation5 + $0x36c] ss:$16 sps:$4 sm:$0xff]  }
  0xa0   :  { %1536 = vmatpush2.bf16.msra.mxu1 %v4645_v6  ;;  %1474 = vmatprep.subr.bf16.mxu0 %v4650_v7  ;;  %v4746_v6 = vld [vmem:[#allocation5 + $0x56c] ss:$16 sps:$4 sm:$0xff]   ;;  %v4741_v7 = vld [vmem:[#allocation5 + $0x368] ss:$16 sps:$4 sm:$0xff]  }
  0xa1   :  { %1537 = vmatprep.subr.bf16.mxu1 %v4653_v8  ;;  %v4744_v8 = vld [vmem:[#allocation5 + $0x568] ss:$16 sps:$4 sm:$0xff]  }
  0xa3   :  { %1475 = vmatpush2.bf16.msra.mxu0 %v4648_v9  ;;  %v4749_v9 = vld [vmem:[#allocation5 + $0x34c] ss:$16 sps:$4 sm:$0xff]  }
  0xa4   :  { %1538 = vmatpush2.bf16.msra.mxu1 %v4651_v10  ;;  %1476 = vmatprep.subr.bf16.mxu0 %v4656_v11  ;;  %v4752_v10 = vld [vmem:[#allocation5 + $0x54c] ss:$16 sps:$4 sm:$0xff]   ;;  %v4747_v11 = vld [vmem:[#allocation5 + $0x348] ss:$16 sps:$4 sm:$0xff]  }
  0xa5   :  { %1539 = vmatprep.subr.bf16.mxu1 %v4659_v12  ;;  %v4750_v12 = vld [vmem:[#allocation5 + $0x548] ss:$16 sps:$4 sm:$0xff]  }
  0xa7   :  { %1477 = vmatpush2.bf16.msra.mxu0 %v4654_v13  ;;  %v4755_v13 = vld [vmem:[#allocation5 + $0x32c] ss:$16 sps:$4 sm:$0xff]  }
  0xa8   :  { %1540 = vmatpush2.bf16.msra.mxu1 %v4657_v14  ;;  %1572 = vmatprep.subr.bf16.mxu0 %v4665_v15  ;;  %v4758_v14 = vld [vmem:[#allocation5 + $0x52c] ss:$16 sps:$4 sm:$0xff]   ;;  %v4753_v15 = vld [vmem:[#allocation5 + $0x328] ss:$16 sps:$4 sm:$0xff]  }
  0xa9   :  { %1635 = vmatprep.subr.bf16.mxu1 %v4668_v16  ;;  %v4756_v16 = vld [vmem:[#allocation5 + $0x528] ss:$16 sps:$4 sm:$0xff]  }
  0xaa   :  { %1479 = vmatmul.mubr.bf16.vlgmr.msra.gmra.mxu0 %v5119_v17 }
  0xab   :  { %1542 = vmatmul.mubr.bf16.vlgmr.msra.gmra.mxu1 %v5097_v4  ;;  %1573 = vmatpush1.bf16.msra.mxu0 %v4663_v18  ;;  %v4689_v4 = vld [vmem:[#allocation5 + $0x48c] ss:$16 sps:$4 sm:$0xff]  }
  0xac   :  { %1636 = vmatpush1.bf16.msra.mxu1 %v4666_v19  ;;  %1574 = vmatprep.subr.bf16.mxu0 %v4671_v20  ;;  %v4761_v18 = vld [vmem:[#allocation5 + $0x30c] ss:$16 sps:$4 sm:$0xff]   ;;  %v4759_v20 = vld [vmem:[#allocation5 + $0x308] ss:$16 sps:$4 sm:$0xff]  }
  0xad   :  { %1637 = vmatprep.subr.bf16.mxu1 %v4674_v21  ;;  %1488 = vmatprep.mubr.bf16.mxu0 %v5121_v23  ;;  %v4764_v19 = vld [vmem:[#allocation5 + $0x50c] ss:$16 sps:$4 sm:$0xff]   ;;  %v4762_v21 = vld [vmem:[#allocation5 + $0x508] ss:$16 sps:$4 sm:$0xff]  }
  0xae   :  { %1551 = vmatprep.mubr.bf16.mxu1 %v5100_v22  ;;  %v5133_v22 = vld [vmem:[#allocation2 + $0x70] ss:$24 sps:$4 sm:$0xff]  }
  0xaf   :  { %1575 = vmatpush1.bf16.msra.mxu0 %v4669_v25  ;;  %v4765_v25 = vld [vmem:[#allocation7 + $0x78] sm:$0xff]  }
  0xb0   :  { %1638 = vmatpush1.bf16.msra.mxu1 %v4672_v26  ;;  %1576 = vmatprep.subr.bf16.mxu0 %v4680_v27  ;;  %v4766_v26 = vld [vmem:[#allocation7 + $0x38] sm:$0xff]   ;;  %v4767_v27 = vld [vmem:[#allocation7 + $0x70] sm:$0xff]  }
  0xb1   :  { %1639 = vmatprep.subr.bf16.mxu1 %v4683_v28  ;;  %v4957_v28 = vld [vmem:[#allocation2 + $0x8] ss:$24 sps:$4 sm:$0xff]  }
  0xb2   :  { %1489 = vmatmul.mubr.bf16.gmra.mxu0 %v5126_v29 }
  0xb3   :  { %1552 = vmatmul.mubr.bf16.gmra.mxu1 %v5102_v24  ;;  %1577 = vmatpush1.bf16.msra.mxu0 %v4678_v30  ;;  %v4699_v24 = vld [vmem:[#allocation5 + $0x248] ss:$16 sps:$4 sm:$0xff]   ;;  %v4958_v30 = vld [vmem:[#allocation2 + $0x3c] ss:$24 sps:$4 sm:$0xff]  }
  0xb4   :  { %1640 = vmatpush1.bf16.msra.mxu1 %v4681_v31  ;;  %1578 = vmatprep.subr.bf16.mxu0 %v4686_v32  ;;  %v4768_v31 = vld [vmem:[#allocation7 + $0x30] sm:$0xff]   ;;  %v4769_v32 = vld [vmem:[#allocation7 + $0x68] sm:$0xff]  }
  0xb5   :  { %1641 = vmatprep.subr.bf16.mxu1 %v4689_v4  ;;  %1498 = vmatprep.mubr.bf16.mxu0 %v5129_v33  ;;  %v4770_v4 = vld [vmem:[#allocation7 + $0x28] sm:$0xff]  }
  0xb6   :  { %1561 = vmatprep.mubr.bf16.mxu1 %v5106_v34  ;;  %v4708_v34 = vld [vmem:[#allocation5 + $0x428] ss:$16 sps:$4 sm:$0xff]  }
  0xb7   :  { %1579 = vmatpush1.bf16.msra.mxu0 %v4684_v37  ;;  %v4771_v37 = vld [vmem:[#allocation7 + $0x60] sm:$0xff]  }
  0xb8   :  { %1642 = vmatpush1.bf16.msra.mxu1 %v4687_v38  ;;  %1580 = vmatprep.subr.bf16.mxu0 %v4695_v39  ;;  %v4959_v38 = vld [vmem:[#allocation2 + $0x38] ss:$24 sps:$4 sm:$0xff]   ;;  %v4774_v39 = vld [vmem:[#allocation7 + $0x18] sm:$0xff]  }
  0xb9   :  { %1643 = vmatprep.subr.bf16.mxu1 %v4698_v40  ;;  %v4775_v40 = vld [vmem:[#allocation7 + $0x50] sm:$0xff]  }
  0xba   :  { %1499 = vmatmul.mubr.bf16.gmra.mxu0 %v5133_v22 }
  0xbb   :  { %1562 = vmatmul.mubr.bf16.gmra.mxu1 %v5110_v36  ;;  %1581 = vmatpush1.bf16.msra.mxu0 %v4693_v41  ;;  %v4714_v36 = vld [vmem:[#allocation5 + $0x408] ss:$16 sps:$4 sm:$0xff]  }
  0xbc   :  { %1644 = vmatpush1.bf16.msra.mxu1 %v4696_v42  ;;  %1582 = vmatprep.subr.bf16.mxu0 %v4701_v43  ;;  %v4960_v41 = vld [vmem:[#allocation2 + $0x68] ss:$24 sps:$4 sm:$0xff]   ;;  %v4780_v43 = vld [vmem:[#allocation7] sm:$0xff]  }
  0xbd   :  { %1645 = vmatprep.subr.bf16.mxu1 %v4704_v44  ;;  %1604 = vmatprep.mubr.bf16.mxu0 %v5093_v51  ;;  %v4728_v51 = vld [vmem:[#allocation5 + $0x5cc] ss:$16 sps:$4 sm:$0xff]   ;;  %v4776_v42 = vld [vmem:[#allocation7 + $0x10] sm:$0xff]  }
  0xbe   :  { %1667 = vmatprep.mubr.bf16.mxu1 %v5116_v46  ;;  %v4723_v46 = vld [vmem:[#allocation5 + $0x3c8] ss:$16 sps:$4 sm:$0xff]  }
  0xbf   :  { %1583 = vmatpush1.bf16.msra.mxu0 %v4699_v24  ;;  %v4781_v44 = vld [vmem:[#allocation7 + $0x178] sm:$0xff]  }
  0xc0   :  { %1646 = vmatpush1.bf16.msra.mxu1 %v4702_v45  ;;  %1584 = vmatprep.subr.bf16.mxu0 %v4707_v47  ;;  %v4799_v24 = vld [vmem:[#allocation7 + $0xf8] sm:$0xff]   ;;  %v4803_v47 = vld [vmem:[#allocation7 + $0xf0] sm:$0xff]  }
  0xc1   :  { %1647 = vmatprep.subr.bf16.mxu1 %v4710_v48  ;;  %v4800_v45 = vld [vmem:[#allocation7 + $0xb8] sm:$0xff]   ;;  %v4807_v48 = vld [vmem:[#allocation7 + $0xe8] sm:$0xff]  }
  0xc3   :  { %1585 = vmatpush1.bf16.msra.mxu0 %v4705_v50  ;;  %v4808_v50 = vld [vmem:[#allocation7 + $0xa8] sm:$0xff]  }
  0xc4   :  { %1648 = vmatpush1.bf16.msra.mxu1 %v4708_v34  ;;  %1586 = vmatprep.subr.bf16.mxu0 %v4713_v52  ;;  %v4811_v34 = vld [vmem:[#allocation7 + $0xe0] sm:$0xff]  }
  0xc5   :  { %1649 = vmatprep.subr.bf16.mxu1 %v4716_v49  ;;  %v4812_v52 = vld [vmem:[#allocation7 + $0xa0] sm:$0xff]   ;;  %v4815_v49 = vld [vmem:[#allocation7 + $0xd8] sm:$0xff]  }
  0xc7   :  { %1587 = vmatpush1.bf16.msra.mxu0 %v4711_v53  ;;  %v4816_v53 = vld [vmem:[#allocation7 + $0x98] sm:$0xff]  }
  0xc8   :  { %1650 = vmatpush1.bf16.msra.mxu1 %v4714_v36  ;;  %1588 = vmatprep.subr.bf16.mxu0 %v4719_v54  ;;  %v4819_v36 = vld [vmem:[#allocation7 + $0xd0] sm:$0xff]  }
  0xc9   :  { %1651 = vmatprep.subr.bf16.mxu1 %v4722_v55  ;;  %v4820_v54 = vld [vmem:[#allocation7 + $0x90] sm:$0xff]  }
  0xcb   :  { %1589 = vmatpush2.bf16.msra.mxu0 %v4717_v56 }
  0xcc   :  { %1652 = vmatpush2.bf16.msra.mxu1 %v4720_v57  ;;  %1590 = vmatprep.subr.bf16.mxu0 %v4725_v58  ;;  %v4823_v57 = vld [vmem:[#allocation7 + $0xc8] sm:$0xff]  }
  0xcd   :  { %1653 = vmatprep.subr.bf16.mxu1 %v4728_v51  ;;  %v4824_v58 = vld [vmem:[#allocation7 + $0x88] sm:$0xff]  }
  0xcf   :  { %1591 = vmatpush2.bf16.msra.mxu0 %v4723_v46 }
  0xd0   :  { %1654 = vmatpush2.bf16.msra.mxu1 %v4726_v59  ;;  %1592 = vmatprep.subr.bf16.mxu0 %v4731_v60  ;;  %v4827_v59 = vld [vmem:[#allocation7 + $0xc0] sm:$0xff]  }
  0xd1   :  { %1655 = vmatprep.subr.bf16.mxu1 %v4734_v61  ;;  %v4828_v60 = vld [vmem:[#allocation7 + $0x80] sm:$0xff]  }
  0xd3   :  { %1593 = vmatpush2.bf16.msra.mxu0 %v4729_v62 }
  0xd4   :  { %1656 = vmatpush2.bf16.msra.mxu1 %v4732_v63  ;;  %1594 = vmatprep.subr.bf16.mxu0 %v4737_v0  ;;  %v4831_v63 = vld [vmem:[#allocation7 + $0x1f8] sm:$0xff]  }
  0xd5   :  { %1657 = vmatprep.subr.bf16.mxu1 %v4740_v1 }
  0xd7   :  { %1595 = vmatpush2.bf16.msra.mxu0 %v4735_v2 }
  0xd8   :  { %1658 = vmatpush2.bf16.msra.mxu1 %v4738_v3  ;;  %1596 = vmatprep.subr.bf16.mxu0 %v4743_v5 }
  0xd9   :  { %1659 = vmatprep.subr.bf16.mxu1 %v4746_v6 }
  0xdb   :  { %1597 = vmatpush2.bf16.msra.mxu0 %v4741_v7 }
  0xdc   :  { %1660 = vmatpush2.bf16.msra.mxu1 %v4744_v8  ;;  %1598 = vmatprep.subr.bf16.mxu0 %v4749_v9 }
  0xdd   :  { %1661 = vmatprep.subr.bf16.mxu1 %v4752_v10 }
  0xdf   :  { %1599 = vmatpush2.bf16.msra.mxu0 %v4747_v11 }
  0xe0   :  { %1662 = vmatpush2.bf16.msra.mxu1 %v4750_v12  ;;  %1600 = vmatprep.subr.bf16.mxu0 %v4755_v13 }
  0xe1   :  { %1663 = vmatprep.subr.bf16.mxu1 %v4758_v14 }
  0xe3   :  { %1601 = vmatpush2.bf16.msra.mxu0 %v4753_v15 }
  0xe4   :  { %1664 = vmatpush2.bf16.msra.mxu1 %v4756_v16  ;;  %1602 = vmatprep.subr.bf16.mxu0 %v4761_v18 }
  0xe5   :  { %1665 = vmatprep.subr.bf16.mxu1 %v4764_v19 }
  0xe7   :  { %1603 = vmatpush2.bf16.msra.mxu0 %v4759_v20 }
  0xe8   :  { %1666 = vmatpush2.bf16.msra.mxu1 %v4762_v21  ;;  %4176 = vmatprep.subr.bf16.mxu0 %v4765_v25 }
  0xe9   :  { %4198 = vmatprep.subr.bf16.mxu1 %v4799_v24 }
  0xea   :  { %1605 = vmatmul.mubr.bf16.vlgmr.msra.gmra.mxu0 %v4957_v28 }
  0xeb   :  { %1668 = vmatmul.mubr.bf16.vlgmr.msra.gmra.mxu1 %v5119_v17  ;;  %1614 = vmatprep.mubr.bf16.mxu0 %v4958_v30  ;;  %v4772_v17 = vld [vmem:[#allocation7 + $0x20] sm:$0xff]  }
  0xec   :  { %1677 = vmatprep.mubr.bf16.mxu1 %v5121_v23  ;;  %4177 = vmatpush3.bf16.msra.mxu0 %v4766_v26  ;;  %v4773_v23 = vld [vmem:[#allocation7 + $0x58] sm:$0xff]  }
  0xed   :  { %4178 = vmatprep.subr.bf16.mxu0 %v4767_v27  ;;  %4199 = vmatpush3.bf16.msra.mxu1 %v4800_v45  ;;  %v4786_v45 = vld [vmem:[#allocation7 + $0x128] sm:$0xff]  }
  0xee   :  { %4200 = vmatprep.subr.bf16.mxu1 %v4803_v47 }
  0xf0   :  { %4179 = vmatpush3.bf16.msra.mxu0 %v4768_v31 }
  0xf1   :  { %4180 = vmatprep.subr.bf16.mxu0 %v4769_v32 }
  0xf2   :  { %1615 = vmatmul.mubr.bf16.gmra.mxu0 %v4959_v38 }
  0xf3   :  { %1678 = vmatmul.mubr.bf16.gmra.mxu1 %v5126_v29  ;;  %1624 = vmatprep.mubr.bf16.mxu0 %v5108_v35  ;;  %v4777_v29 = vld [vmem:[#allocation7 + $0x48] sm:$0xff]  }
  0xf4   :  { %1687 = vmatprep.mubr.bf16.mxu1 %v5129_v33  ;;  %4181 = vmatpush3.bf16.msra.mxu0 %v4770_v4  ;;  %v4778_v35 = vld [vmem:[#allocation7 + $0x8] sm:$0xff]   ;;  %v4779_v33 = vld [vmem:[#allocation7 + $0x40] sm:$0xff]  }
  0xf5   :  { %4182 = vmatprep.subr.bf16.mxu0 %v4771_v37 }
  0xf8   :  { %4183 = vmatpush3.bf16.msra.mxu0 %v4772_v17 }
  0xf9   :  { %4184 = vmatprep.subr.bf16.mxu0 %v4773_v23  ;;  %v4782_v23 = vld [vmem:[#allocation7 + $0x138] sm:$0xff]  }
  0xfa   :  { %1625 = vmatmul.mubr.bf16.gmra.mxu0 %v4960_v41  ;;  %v4783_v41 = vld [vmem:[#allocation7 + $0x170] sm:$0xff]  }
  0xfb   :  { %1688 = vmatmul.mubr.bf16.gmra.mxu1 %v5133_v22  ;;  %v4804_v22 = vld [vmem:[#allocation7 + $0xb0] sm:$0xff]  }
  0xfc   :  { %4185 = vmatpush3.bf16.msra.mxu0 %v4774_v39  ;;  %4201 = vmatpush3.bf16.msra.mxu1 %v4804_v22  ;;  %v4787_v22 = vld [vmem:[#allocation7 + $0x160] sm:$0xff]  }
  0xfd   :  { %4186 = vmatprep.subr.bf16.mxu0 %v4775_v40  ;;  %4202 = vmatprep.subr.bf16.mxu1 %v4807_v48 }
 0x100   :  { %4187 = vmatpush3.bf16.msra.mxu0 %v4776_v42  ;;  %4203 = vmatpush3.bf16.msra.mxu1 %v4808_v50 }
 0x101   :  { %4188 = vmatprep.subr.bf16.mxu0 %v4777_v29  ;;  %4204 = vmatprep.subr.bf16.mxu1 %v4811_v34  ;;  %v4788_v34 = vld [vmem:[#allocation7 + $0x120] sm:$0xff]  }
 0x104   :  { %4189 = vmatpush3.bf16.msra.mxu0 %v4778_v35  ;;  %4205 = vmatpush3.bf16.msra.mxu1 %v4812_v52 }
 0x105   :  { %4190 = vmatprep.subr.bf16.mxu0 %v4779_v33  ;;  %4206 = vmatprep.subr.bf16.mxu1 %v4815_v49  ;;  %v4784_v33 = vld [vmem:[#allocation7 + $0x130] sm:$0xff]   ;;  %v4789_v49 = vld [vmem:[#allocation7 + $0x158] sm:$0xff]  }
 0x108   :  { %4191 = vmatpush3.bf16.msra.mxu0 %v4780_v43  ;;  %4207 = vmatpush3.bf16.msra.mxu1 %v4816_v53 }
 0x109   :  { %4220 = vmatprep.subr.bf16.mxu0 %v4781_v44  ;;  %4208 = vmatprep.subr.bf16.mxu1 %v4819_v36  ;;  %v4785_v44 = vld [vmem:[#allocation7 + $0x168] sm:$0xff]  }
 0x10c   :  { %4209 = vmatpush3.bf16.msra.mxu1 %v4820_v54 }
 0x10d   :  { %4210 = vmatprep.subr.bf16.mxu1 %v4823_v57  ;;  %v4791_v57 = vld [vmem:[#allocation7 + $0x150] sm:$0xff]  }
 0x110   :  { %4211 = vmatpush3.bf16.msra.mxu1 %v4824_v58 }
 0x111   :  { %4212 = vmatprep.subr.bf16.mxu1 %v4827_v59  ;;  %v4793_v59 = vld [vmem:[#allocation7 + $0x148] sm:$0xff]  }
 0x114   :  { %4213 = vmatpush3.bf16.msra.mxu1 %v4828_v60 }
 0x115   :  { %4242 = vmatprep.subr.bf16.mxu1 %v4831_v63  ;;  %v4794_v63 = vld [vmem:[#allocation7 + $0x108] sm:$0xff]  }
 0x12a   :  { %v1354_v55 = vpop.f32.mrf.mxu0 }
 0x12b   :  { %v1417_v56 = vpop.f32.mrf.mxu1 }
 0x12c   :  { %v1356_v51 = vpop.f32.mrf.mxu0  ;;  %v1418_v27 = vadd.f32 %v1417_v56, %v1354_v55  ;;  %v4790_v55 = vld [vmem:[#allocation7 + $0x118] sm:$0xff]  }
 0x12d   :  { %v1419_v46 = vpop.f32.mrf.mxu1 }
 0x12e   :  { %v5147_v61 = vpop.f32.mrf.mxu0  ;;  %v1420_v30 = vadd.f32 %v1419_v46, %v1356_v51  ;;  %v4792_v46 = vld [vmem:[#allocation7 + $0x110] sm:$0xff]  }
 0x12f   :  { %v5149_v62 = vpop.f32.mrf.mxu1 }
 0x130   :  { %v1360_v0 = vpop.f32.mrf.mxu0 }
 0x131   :  { %v1423_v1 = vpop.f32.mrf.mxu1 }
 0x132   :  { %v5151_v2 = vpop.f32.mrf.mxu0  ;;  %v1424_v38 = vadd.f32 %v1423_v1, %v1360_v0  ;;  %v4795_v0 = vld [vmem:[#allocation7 + $0x140] sm:$0xff]   ;;  %v1422_v1 = vadd.f32 %v5149_v62, %v5147_v61  ;;  %v4802_v62 = vld [vmem:[#allocation7 + $0x230] sm:$0xff]  }
 0x133   :  { %v5153_v3 = vpop.f32.mrf.mxu1 }
 0x134   :  { %v5155_v5 = vpop.f32.mrf.mxu0 }
 0x135   :  { %v5157_v6 = vpop.f32.mrf.mxu1 }
 0x136   :  { %v1368_v7 = vpop.f32.mrf.mxu0 }
 0x137   :  { %v1431_v8 = vpop.f32.mrf.mxu1 }
 0x138   :  { %v5159_v9 = vadd.f32 %v1431_v8, %v1368_v7  ;;  %v5161_v10 = vpop.f32.mrf.mxu0  ;;  %v1430_v8 = vadd.f32 %v5157_v6, %v5155_v5  ;;  %v4805_v5 = vld [vmem:[#allocation7 + $0x268] sm:$0xff]  }
 0x139   :  { %v5163_v11 = vpop.f32.mrf.mxu1 }
 0x13a   :  { %v1374_v12 = vpop.f32.mrf.mxu0 }
 0x13b   :  { %v1437_v13 = vpop.f32.mrf.mxu1 }
 0x13c   :  { %v1438_v14 = vadd.f32 %v1437_v13, %v1374_v12  ;;  %v5165_v15 = vpop.f32.mrf.mxu0  ;;  %v4796_v12 = vld [vmem:[#allocation7 + $0x100] sm:$0xff]  }
 0x13d   :  { %v5167_v16 = vpop.f32.mrf.mxu1 }
 0x13e   :  { %v1378_v18 = vpop.f32.mrf.mxu0 }
 0x13f   :  { %v1441_v19 = vpop.f32.mrf.mxu1 }
 0x140   :  { %v1442_v20 = vadd.f32 %v1441_v19, %v1378_v18  ;;  %v1380_v21 = vpop.f32.mrf.mxu0 }
 0x141   :  { %v1443_v25 = vpop.f32.mrf.mxu1 }
 0x142   :  { %v1444_v26 = vadd.f32 %v1443_v25, %v1380_v21  ;;  %v4801_v25 = vld [vmem:[#allocation7 + $0x270] sm:$0xff]  }
 0x16a   :  { %v1480_v28 = vpop.f32.mrf.mxu0 }
 0x16b   :  { %v1481_v31 = vadd.f32 %v1480_v28, %v1418_v27  ;;  %v5179_v53 = vpop.f32.mrf.mxu1  ;;  %v4806_v27 = vld [vmem:[#allocation7 + $0x228] sm:$0xff]  }
 0x16c   :  { %v1482_v32 = vpop.f32.mrf.mxu0 }
 0x16d   :  { %v1483_v4 = vadd.f32 %v1482_v32, %v1420_v30  ;;  %v1698_v39 = vpack.c.bf16 %v1481_v31, %v1481_v31  ;;  %v5185_v51 = vpop.f32.mrf.mxu1  ;;  %v4809_v30 = vld [vmem:[#allocation7 + $0x260] sm:$0xff]  }
 0x16e   :  { %v1484_v37 = vpop.f32.mrf.mxu0  ;;  %v4810_v31 = vld [vmem:[#allocation7 + $0x220] sm:$0xff]  }
 0x16f   :  { %v1699_v17 = vpack.c.bf16 %v1483_v4, %v1483_v4  ;;  %v5187_v60 = vpop.f32.mrf.mxu1  ;;  %v1485_v13 = vadd.f32 %v1484_v37, %v1422_v1  ;;  %v4813_v4 = vld [vmem:[#allocation7 + $0x258] sm:$0xff]  }
 0x170   :  { %v1486_v40 = vpop.f32.mrf.mxu0  ;;  %v4814_v37 = vld [vmem:[#allocation7 + $0x218] sm:$0xff]  }
 0x171   :  { %v1487_v42 = vadd.f32 %v1486_v40, %v1424_v38  ;;  %2017 = vmatprep.mubr.bf16.mxu0 %v1699_v17  ;;  %v5191_v7 = vpop.f32.mrf.mxu1  ;;  %v1702_v21 = vpack.c.bf16 %v1485_v13, %v1485_v13  ;;  %v4817_v17 = vld [vmem:[#allocation7 + $0x250] sm:$0xff]   ;;  %v4821_v40 = vld [vmem:[#allocation7 + $0x248] sm:$0xff]  }
 0x172   :  { %v5169_v29 = vpop.f32.mrf.mxu0  ;;  %2018 = vmatmul.mubr.bf16.vlgmr.msra.gmra.mxu0 %v1698_v39  ;;  %v4834_v13 = vld [vmem:[#allocation7 + $0x330] sm:$0xff]  }
 0x173   :  { %v1703_v35 = vpack.c.bf16 %v1487_v42, %v1487_v42  ;;  %4221 = vmatpush3.bf16.msra.mxu0 %v4782_v23  ;;  %v5195_v18 = vpop.f32.mrf.mxu1  ;;  %v4818_v23 = vld [vmem:[#allocation7 + $0x210] sm:$0xff]  }
 0x174   :  { %v1492_v43 = vpop.f32.mrf.mxu0  ;;  %4222 = vmatprep.subr.bf16.mxu0 %v4783_v41  ;;  %v4822_v41 = vld [vmem:[#allocation7 + $0x208] sm:$0xff]  }
 0x175   :  { %2355 = vmatprep.mubr.bf16.mxu0 %v1703_v35  ;;  %v1493_v19 = vadd.f32 %v1492_v43, %v1430_v8  ;;  %v4825_v35 = vld [vmem:[#allocation7 + $0x240] sm:$0xff]  }
 0x176   :  { %v5171_v24 = vpop.f32.mrf.mxu0 }
 0x177   :  { %4223 = vmatpush3.bf16.msra.mxu0 %v4784_v33  ;;  %v1707_v61 = vpack.c.bf16 %v1493_v19, %v1493_v19  ;;  %v1428_v33 = vadd.f32 %v5153_v3, %v5151_v2  ;;  %v4837_v19 = vld [vmem:[#allocation7 + $0x368] sm:$0xff]  }
 0x178   :  { %v5173_v47 = vpop.f32.mrf.mxu0  ;;  %4224 = vmatprep.subr.bf16.mxu0 %v4785_v44 }
 0x17a   :  { %v1500_v48 = vpop.f32.mrf.mxu0 }
 0x17b   :  { %v5175_v50 = vadd.f32 %v1500_v48, %v1438_v14  ;;  %4225 = vmatpush3.bf16.msra.mxu0 %v4786_v45  ;;  %v4797_v14 = vld [vmem:[#allocation7 + $0x278] sm:$0xff]   ;;  %v1434_v45 = vadd.f32 %v5163_v11, %v5161_v10  ;;  %v4826_v48 = vld [vmem:[#allocation7 + $0x200] sm:$0xff]  }
 0x17c   :  { %v5177_v52 = vpop.f32.mrf.mxu0  ;;  %4226 = vmatprep.subr.bf16.mxu0 %v4787_v22  ;;  %v4830_v11 = vld [vmem:[#allocation7 + $0x338] sm:$0xff]  }
 0x17e   :  { %v1504_v36 = vpop.f32.mrf.mxu0 }
 0x17f   :  { %v5181_v54 = vadd.f32 %v1504_v36, %v1442_v20  ;;  %4227 = vmatpush3.bf16.msra.mxu0 %v4788_v34  ;;  %v4798_v20 = vld [vmem:[#allocation7 + $0x238] sm:$0xff]   ;;  %v1491_v34 = vadd.f32 %v5169_v29, %v1428_v33  ;;  %v4833_v29 = vld [vmem:[#allocation7 + $0x370] sm:$0xff]  }
 0x180   :  { %v1506_v56 = vpop.f32.mrf.mxu0  ;;  %4228 = vmatprep.subr.bf16.mxu0 %v4789_v49 }
 0x181   :  { %v5183_v58 = vadd.f32 %v1506_v56, %v1444_v26  ;;  %v5197_v26 = vpop.f32.mrf.mxu1  ;;  %v1497_v56 = vadd.f32 %v5173_v47, %v1434_v45  ;;  %v4832_v47 = vld [vmem:[#allocation7 + $0x1b8] sm:$0xff]   ;;  %v4855_v45 = vld [vmem:[#allocation7 + $0x1c8] sm:$0xff]  }
 0x183   :  { %4229 = vmatpush3.bf16.msra.mxu0 %v4790_v55  ;;  %v5199_v6 = vpop.f32.mrf.mxu1  ;;  %v4829_v55 = vld [vmem:[#allocation7 + $0x378] sm:$0xff]  }
 0x184   :  { %4230 = vmatprep.subr.bf16.mxu0 %v4791_v57 }
 0x185   :  { %v5201_v28 = vpop.f32.mrf.mxu1 }
 0x187   :  { %4231 = vmatpush3.bf16.msra.mxu0 %v4792_v46  ;;  %v5203_v32 = vpop.f32.mrf.mxu1 }
 0x188   :  { %4232 = vmatprep.subr.bf16.mxu0 %v4793_v59 }
 0x189   :  { %v5205_v38 = vpop.f32.mrf.mxu1 }
 0x18b   :  { %4233 = vmatpush3.bf16.msra.mxu0 %v4794_v63  ;;  %v5207_v39 = vpop.f32.mrf.mxu1  ;;  %v1711_v63 = vpack.c.bf16 %v1497_v56, %v1497_v56  ;;  %v4858_v56 = vld [vmem:[#allocation7 + $0x300] sm:$0xff]  }
 0x18c   :  { %4234 = vmatprep.subr.bf16.mxu0 %v4795_v0 }
 0x18d   :  { %v5209_v42 = vpop.f32.mrf.mxu1 }
 0x18f   :  { %4235 = vmatpush3.bf16.msra.mxu0 %v4796_v12 }
 0x190   :  { %4264 = vmatprep.subr.bf16.mxu0 %v4797_v14  ;;  %v4835_v14 = vld [vmem:[#allocation7 + $0x1f0] sm:$0xff]  }
 0x192   :  { %2356 = vmatmul.mubr.bf16.vlgmr.msra.gmra.mxu0 %v1702_v21  ;;  %v4836_v21 = vld [vmem:[#allocation7 + $0x1b0] sm:$0xff]  }
 0x193   :  { %4265 = vmatpush3.bf16.msra.mxu0 %v4798_v20  ;;  %2693 = vmatprep.mubr.bf16.mxu0 %v1707_v61  ;;  %v4841_v61 = vld [vmem:[#allocation7 + $0x360] sm:$0xff]  }
 0x194   :  { %4266 = vmatprep.subr.bf16.mxu0 %v4801_v25  ;;  %v4838_v25 = vld [vmem:[#allocation7 + $0x328] sm:$0xff]  }
 0x197   :  { %4267 = vmatpush3.bf16.msra.mxu0 %v4802_v62  ;;  %v4840_v62 = vld [vmem:[#allocation7 + $0x1a8] sm:$0xff]  }
 0x198   :  { %4268 = vmatprep.subr.bf16.mxu0 %v4805_v5  ;;  %v4842_v5 = vld [vmem:[#allocation7 + $0x320] sm:$0xff]  }
 0x19b   :  { %4269 = vmatpush3.bf16.msra.mxu0 %v4806_v27  ;;  %v4843_v27 = vld [vmem:[#allocation7 + $0x1e0] sm:$0xff]  }
 0x19c   :  { %4270 = vmatprep.subr.bf16.mxu0 %v4809_v30  ;;  %v4845_v30 = vld [vmem:[#allocation7 + $0x358] sm:$0xff]  }
 0x19f   :  { %4271 = vmatpush3.bf16.msra.mxu0 %v4810_v31  ;;  %v4844_v31 = vld [vmem:[#allocation7 + $0x1a0] sm:$0xff]  }
 0x1a0   :  { %4272 = vmatprep.subr.bf16.mxu0 %v4813_v4  ;;  %v4846_v4 = vld [vmem:[#allocation7 + $0x318] sm:$0xff]  }
 0x1a3   :  { %4273 = vmatpush3.bf16.msra.mxu0 %v4814_v37  ;;  %v4847_v37 = vld [vmem:[#allocation7 + $0x1d8] sm:$0xff]  }
 0x1a4   :  { %4274 = vmatprep.subr.bf16.mxu0 %v4817_v17  ;;  %v4849_v17 = vld [vmem:[#allocation7 + $0x350] sm:$0xff]  }
 0x1a7   :  { %4275 = vmatpush3.bf16.msra.mxu0 %v4818_v23  ;;  %v4848_v23 = vld [vmem:[#allocation7 + $0x198] sm:$0xff]  }
 0x1a8   :  { %4276 = vmatprep.subr.bf16.mxu0 %v4821_v40  ;;  %v4850_v40 = vld [vmem:[#allocation7 + $0x310] sm:$0xff]  }
 0x1aa   :  { %v1606_v43 = vpop.f32.mrf.mxu0 }
 0x1ab   :  { %v1669_v44 = vpop.f32.mrf.mxu1  ;;  %v1607_v22 = vadd.f32 %v1606_v43, %v5179_v53  ;;  %4277 = vmatpush3.bf16.msra.mxu0 %v4822_v41  ;;  %v1706_v53 = vpack.c.bf16 %v1491_v34, %v1491_v34  ;;  %v4851_v41 = vld [vmem:[#allocation7 + $0x1d0] sm:$0xff]  }
 0x1ac   :  { %v1608_v49 = vpop.f32.mrf.mxu0  ;;  %4278 = vmatprep.subr.bf16.mxu0 %v4825_v35  ;;  %v4853_v35 = vld [vmem:[#allocation7 + $0x348] sm:$0xff]   ;;  %v4852_v43 = vld [vmem:[#allocation7 + $0x190] sm:$0xff]  }
 0x1ad   :  { %v1671_v36 = vpop.f32.mrf.mxu1  ;;  %v1609_v57 = vadd.f32 %v1608_v49, %v5185_v51  ;;  %v1670_v46 = vadd.f32 %v1669_v44, %v1607_v22  ;;  %v4854_v44 = vld [vmem:[#allocation7 + $0x308] sm:$0xff]   ;;  %v4857_v22 = vld [vmem:[#allocation7 + $0x340] sm:$0xff]  }
 0x1ae   :  { %v5219_v2 = vpop.f32.mrf.mxu0  ;;  %v4856_v49 = vld [vmem:[#allocation7 + $0x188] sm:$0xff]  }
 0x1af   :  { %v5221_v3 = vpop.f32.mrf.mxu1  ;;  %v1672_v10 = vadd.f32 %v1671_v36, %v1609_v57  ;;  %4279 = vmatpush3.bf16.msra.mxu0 %v4826_v48  ;;  %v1700_v51 = vpack.c.bf16 %v1670_v46, %v1670_v46  ;;  %v1440_v36 = vadd.f32 %v5167_v16, %v5165_v15  ;;  %v4859_v57 = vld [vmem:[#allocation7 + $0x1c0] sm:$0xff]   ;;  %v1495_v46 = vadd.f32 %v5171_v24, %v5159_v9  ;;  %v4862_v16 = vld [vmem:[#allocation7 + $0x438] sm:$0xff]  }
 0x1b0   :  { %v1612_v59 = vpop.f32.mrf.mxu0  ;;  %4308 = vmatprep.subr.bf16.mxu0 %v4829_v55  ;;  %v1611_v55 = vadd.f32 %v5219_v2, %v5187_v60  ;;  %v4864_v24 = vld [vmem:[#allocation7 + $0x2b8] sm:$0xff]  }
 0x1b1   :  { %v1701_v0 = vpack.c.bf16 %v1672_v10, %v1672_v10  ;;  %v1613_v1 = vadd.f32 %v1612_v59, %v5191_v7  ;;  %v1675_v8 = vpop.f32.mrf.mxu1  ;;  %v4839_v7 = vld [vmem:[#allocation7 + $0x1e8] sm:$0xff]   ;;  %v1710_v60 = vpack.c.bf16 %v1495_v46, %v1495_v46  ;;  %v1714_v46 = vpack.c.bf16 %v5175_v50, %v5175_v50  ;;  %v4900_v50 = vld [vmem:[#allocation7 + $0x3b0] sm:$0xff]  }
 0x1b2   :  { %2694 = vmatmul.mubr.bf16.vlgmr.msra.gmra.mxu0 %v1706_v53  ;;  %v5224_v33 = vpop.f32.mrf.mxu0  ;;  %v1503_v53 = vadd.f32 %v5177_v52, %v1440_v36  ;;  %v1674_v15 = vadd.f32 %v5221_v3, %v1611_v55  ;;  %v4866_v52 = vld [vmem:[#allocation7 + $0x430] sm:$0xff]   ;;  %v4869_v3 = vld [vmem:[#allocation7 + $0x468] sm:$0xff]   ;;  %v4892_v55 = vld [vmem:[#allocation7 + $0x280] sm:$0xff]  }
 0x1b3   :  { %v1676_v12 = vadd.f32 %v1675_v8, %v1613_v1  ;;  %4309 = vmatpush3.bf16.msra.mxu0 %v4830_v11  ;;  %3031 = vmatprep.mubr.bf16.mxu0 %v1711_v63  ;;  %v5226_v34 = vpop.f32.mrf.mxu1  ;;  %v4861_v11 = vld [vmem:[#allocation7 + $0x478] sm:$0xff]   ;;  %v4867_v1 = vld [vmem:[#allocation7 + $0x2f0] sm:$0xff]  }
 0x1b4   :  { %2057 = vmatprep.mubr.bf16.mxu1 %v1701_v0  ;;  %4310 = vmatprep.subr.bf16.mxu0 %v4833_v29  ;;  %v1618_v48 = vpop.f32.mrf.mxu0  ;;  %v4860_v29 = vld [vmem:[#allocation7 + $0x180] sm:$0xff]   ;;  %v4863_v63 = vld [vmem:[#allocation7 + $0x2f8] sm:$0xff]   ;;  %v4865_v0 = vld [vmem:[#allocation7 + $0x470] sm:$0xff]   ;;  %v1715_v9 = vpack.c.bf16 %v1503_v53, %v1503_v53 }
 0x1b5   :  { %v1705_v20 = vpack.c.bf16 %v1676_v12, %v1676_v12  ;;  %2058 = vmatmul.mubr.bf16.vlgmr.msra.gmra.mxu1 %v1700_v51  ;;  %v1619_v10 = vadd.f32 %v1618_v48, %v5197_v26  ;;  %v1681_v59 = vpop.f32.mrf.mxu1  ;;  %v1704_v26 = vpack.c.bf16 %v1674_v15, %v1674_v15  ;;  %v4870_v51 = vld [vmem:[#allocation7 + $0x428] sm:$0xff]  }
 0x1b6   :  { %4243 = vmatpush3.bf16.msra.mxu1 %v4832_v47  ;;  %v4868_v47 = vld [vmem:[#allocation7 + $0x2b0] sm:$0xff]   ;;  %v4871_v12 = vld [vmem:[#allocation7 + $0x2e8] sm:$0xff]  }
 0x1b7   :  { %4311 = vmatpush3.bf16.msra.mxu0 %v4834_v13  ;;  %4244 = vmatprep.subr.bf16.mxu1 %v4835_v14  ;;  %v1682_v2 = vadd.f32 %v1681_v59, %v1619_v10  ;;  %v4873_v13 = vld [vmem:[#allocation7 + $0x460] sm:$0xff]   ;;  %v4872_v14 = vld [vmem:[#allocation7 + $0x2a8] sm:$0xff]   ;;  %v4897_v10 = vld [vmem:[#allocation7 + $0x570] sm:$0xff]  }
 0x1b8   :  { %2395 = vmatprep.mubr.bf16.mxu1 %v1705_v20  ;;  %4312 = vmatprep.subr.bf16.mxu0 %v4837_v19  ;;  %v4874_v19 = vld [vmem:[#allocation7 + $0x420] sm:$0xff]   ;;  %v4899_v59 = vld [vmem:[#allocation7 + $0x3f0] sm:$0xff]   ;;  %v4901_v15 = vld [vmem:[#allocation7 + $0x568] sm:$0xff]  }
 0x1b9   :  { %v1709_v8 = vpack.c.bf16 %v1682_v2, %v1682_v2  ;;  %v4875_v20 = vld [vmem:[#allocation7 + $0x2e0] sm:$0xff]   ;;  %v4904_v2 = vld [vmem:[#allocation7 + $0x3a8] sm:$0xff]  }
 0x1ba   :  { %4245 = vmatpush3.bf16.msra.mxu1 %v4836_v21  ;;  %v4877_v21 = vld [vmem:[#allocation7 + $0x458] sm:$0xff]  }
 0x1bb   :  { %4313 = vmatpush3.bf16.msra.mxu0 %v4838_v25  ;;  %4246 = vmatprep.subr.bf16.mxu1 %v4839_v7  ;;  %v4876_v25 = vld [vmem:[#allocation7 + $0x2a0] sm:$0xff]   ;;  %v4878_v7 = vld [vmem:[#allocation7 + $0x418] sm:$0xff]  }
 0x1bc   :  { %4314 = vmatprep.subr.bf16.mxu0 %v4841_v61  ;;  %v4879_v61 = vld [vmem:[#allocation7 + $0x2d8] sm:$0xff]  }
 0x1be   :  { %4247 = vmatpush3.bf16.msra.mxu1 %v4840_v62  ;;  %v4881_v62 = vld [vmem:[#allocation7 + $0x450] sm:$0xff]  }
 0x1bf   :  { %4315 = vmatpush3.bf16.msra.mxu0 %v4842_v5  ;;  %4248 = vmatprep.subr.bf16.mxu1 %v4843_v27  ;;  %v4880_v5 = vld [vmem:[#allocation7 + $0x298] sm:$0xff]   ;;  %v4882_v27 = vld [vmem:[#allocation7 + $0x410] sm:$0xff]  }
 0x1c0   :  { %4316 = vmatprep.subr.bf16.mxu0 %v4845_v30  ;;  %v4883_v30 = vld [vmem:[#allocation7 + $0x2d0] sm:$0xff]  }
 0x1c2   :  { %4249 = vmatpush3.bf16.msra.mxu1 %v4844_v31  ;;  %v4885_v31 = vld [vmem:[#allocation7 + $0x448] sm:$0xff]  }
 0x1c3   :  { %4317 = vmatpush3.bf16.msra.mxu0 %v4846_v4  ;;  %4250 = vmatprep.subr.bf16.mxu1 %v4847_v37  ;;  %v5237_v4 = vpop.f32.mrf.mxu0  ;;  %v4884_v37 = vld [vmem:[#allocation7 + $0x290] sm:$0xff]  }
 0x1c4   :  { %4318 = vmatprep.subr.bf16.mxu0 %v4849_v17  ;;  %v4886_v17 = vld [vmem:[#allocation7 + $0x408] sm:$0xff]  }
 0x1c6   :  { %4251 = vmatpush3.bf16.msra.mxu1 %v4848_v23  ;;  %v4887_v23 = vld [vmem:[#allocation7 + $0x2c8] sm:$0xff]  }
 0x1c7   :  { %4319 = vmatpush3.bf16.msra.mxu0 %v4850_v40  ;;  %4252 = vmatprep.subr.bf16.mxu1 %v4851_v41  ;;  %v4889_v40 = vld [vmem:[#allocation7 + $0x440] sm:$0xff]   ;;  %v1622_v41 = vpop.f32.mrf.mxu0 }
 0x1c8   :  { %4320 = vmatprep.subr.bf16.mxu0 %v4853_v35  ;;  %v5239_v35 = vpop.f32.mrf.mxu1  ;;  %v1623_v48 = vadd.f32 %v1622_v41, %v5201_v28  ;;  %v1719_v28 = vpack.c.bf16 %v5183_v58, %v5183_v58  ;;  %v4903_v58 = vld [vmem:[#allocation7 + $0x3e8] sm:$0xff]   ;;  %v4927_v41 = vld [vmem:[#allocation7 + $0x4f0] sm:$0xff]  }
 0x1ca   :  { %4253 = vmatpush3.bf16.msra.mxu1 %v4852_v43  ;;  %v4888_v43 = vld [vmem:[#allocation7 + $0x288] sm:$0xff]   ;;  %v1685_v36 = vpop.f32.mrf.mxu1 }
 0x1cb   :  { %4321 = vmatpush3.bf16.msra.mxu0 %v4854_v44  ;;  %4254 = vmatprep.subr.bf16.mxu1 %v4855_v45  ;;  %v1617_v44 = vadd.f32 %v5224_v33, %v5195_v18  ;;  %v4890_v45 = vld [vmem:[#allocation7 + $0x400] sm:$0xff]   ;;  %v1686_v18 = vadd.f32 %v1685_v36, %v1623_v48  ;;  %v4895_v33 = vld [vmem:[#allocation7 + $0x3f8] sm:$0xff]  }
 0x1cc   :  { %4322 = vmatprep.subr.bf16.mxu0 %v4857_v22  ;;  %v4891_v22 = vld [vmem:[#allocation7 + $0x2c0] sm:$0xff]   ;;  %v4934_v48 = vld [vmem:[#allocation7 + $0x498] sm:$0xff]  }
 0x1ce   :  { %4255 = vmatpush3.bf16.msra.mxu1 %v4856_v49  ;;  %v4893_v49 = vld [vmem:[#allocation7 + $0x578] sm:$0xff]  }
 0x1cf   :  { %4323 = vmatpush3.bf16.msra.mxu0 %v4858_v56  ;;  %4256 = vmatprep.subr.bf16.mxu1 %v4859_v57  ;;  %v1680_v56 = vadd.f32 %v5226_v34, %v1617_v44  ;;  %v4894_v57 = vld [vmem:[#allocation7 + $0x538] sm:$0xff]   ;;  %v4898_v34 = vld [vmem:[#allocation7 + $0x530] sm:$0xff]   ;;  %v4930_v44 = vld [vmem:[#allocation7 + $0x4a8] sm:$0xff]  }
 0x1d0   :  { %4352 = vmatprep.subr.bf16.mxu0 %v4861_v11  ;;  %v4896_v11 = vld [vmem:[#allocation7 + $0x3b8] sm:$0xff]  }
 0x1d1   :  { %v1708_v53 = vpack.c.bf16 %v1680_v56, %v1680_v56  ;;  %v4937_v56 = vld [vmem:[#allocation7 + $0x4c8] sm:$0xff]  }
 0x1d2   :  { %4257 = vmatpush3.bf16.msra.mxu1 %v4860_v29  ;;  %3032 = vmatmul.mubr.bf16.vlgmr.msra.gmra.mxu0 %v1710_v60  ;;  %v1713_v29 = vpack.c.bf16 %v1686_v18, %v1686_v18  ;;  %v4905_v60 = vld [vmem:[#allocation7 + $0x560] sm:$0xff]   ;;  %v4938_v18 = vld [vmem:[#allocation7 + $0x488] sm:$0xff]  }
 0x1d3   :  { %4353 = vmatpush3.bf16.msra.mxu0 %v4862_v16  ;;  %3369 = vmatprep.mubr.bf16.mxu0 %v1715_v9  ;;  %v4902_v16 = vld [vmem:[#allocation7 + $0x528] sm:$0xff]   ;;  %v4909_v9 = vld [vmem:[#allocation7 + $0x558] sm:$0xff]  }
 0x1d4   :  { %4286 = vmatprep.subr.bf16.mxu1 %v4863_v63  ;;  %4354 = vmatprep.subr.bf16.mxu0 %v4865_v0  ;;  %v4906_v63 = vld [vmem:[#allocation7 + $0x520] sm:$0xff]  }
 0x1d5   :  { %2396 = vmatmul.mubr.bf16.vlgmr.msra.gmra.mxu1 %v1704_v26  ;;  %v4907_v0 = vld [vmem:[#allocation7 + $0x3e0] sm:$0xff]   ;;  %v4910_v26 = vld [vmem:[#allocation7 + $0x518] sm:$0xff]  }
 0x1d6   :  { %4287 = vmatpush3.bf16.msra.mxu1 %v4864_v24  ;;  %2733 = vmatprep.mubr.bf16.mxu1 %v1709_v8  ;;  %v4908_v24 = vld [vmem:[#allocation7 + $0x3a0] sm:$0xff]   ;;  %v4912_v8 = vld [vmem:[#allocation7 + $0x398] sm:$0xff]  }
 0x1d7   :  { %4355 = vmatpush3.bf16.msra.mxu0 %v4866_v52  ;;  %4288 = vmatprep.subr.bf16.mxu1 %v4867_v1  ;;  %v4911_v52 = vld [vmem:[#allocation7 + $0x3d8] sm:$0xff]   ;;  %v4913_v1 = vld [vmem:[#allocation7 + $0x550] sm:$0xff]  }
 0x1d8   :  { %4356 = vmatprep.subr.bf16.mxu0 %v4869_v3  ;;  %v4914_v3 = vld [vmem:[#allocation7 + $0x510] sm:$0xff]  }
 0x1da   :  { %4289 = vmatpush3.bf16.msra.mxu1 %v4868_v47  ;;  %v4915_v47 = vld [vmem:[#allocation7 + $0x3d0] sm:$0xff]  }
 0x1db   :  { %4357 = vmatpush3.bf16.msra.mxu0 %v4870_v51  ;;  %4290 = vmatprep.subr.bf16.mxu1 %v4871_v12  ;;  %v4917_v51 = vld [vmem:[#allocation7 + $0x548] sm:$0xff]   ;;  %v5249_v12 = vpop.f32.mrf.mxu0 }
 0x1dc   :  { %4358 = vmatprep.subr.bf16.mxu0 %v4873_v13  ;;  %v4916_v13 = vld [vmem:[#allocation7 + $0x390] sm:$0xff]  }
 0x1de   :  { %4291 = vmatpush3.bf16.msra.mxu1 %v4872_v14  ;;  %v4918_v14 = vld [vmem:[#allocation7 + $0x508] sm:$0xff]  }
 0x1df   :  { %4359 = vmatpush3.bf16.msra.mxu0 %v4874_v19  ;;  %4292 = vmatprep.subr.bf16.mxu1 %v4875_v20  ;;  %v4919_v19 = vld [vmem:[#allocation7 + $0x3c8] sm:$0xff]   ;;  %v4921_v20 = vld [vmem:[#allocation7 + $0x540] sm:$0xff]  }
 0x1e0   :  { %4360 = vmatprep.subr.bf16.mxu0 %v4877_v21  ;;  %v1628_v21 = vpop.f32.mrf.mxu0 }
 0x1e2   :  { %4293 = vmatpush3.bf16.msra.mxu1 %v4876_v25  ;;  %v1689_v25 = vpop.f32.mrf.mxu1  ;;  %v1630_v36 = vpop.f32.mrf.mxu0 }
 0x1e3   :  { %4361 = vmatpush3.bf16.msra.mxu0 %v4878_v7  ;;  %4294 = vmatprep.subr.bf16.mxu1 %v4879_v61  ;;  %v4920_v7 = vld [vmem:[#allocation7 + $0x388] sm:$0xff]   ;;  %v1621_v61 = vadd.f32 %v5237_v4, %v5199_v6  ;;  %v4926_v6 = vld [vmem:[#allocation7 + $0x4b8] sm:$0xff]  }
 0x1e4   :  { %4362 = vmatprep.subr.bf16.mxu0 %v4881_v62  ;;  %v4922_v62 = vld [vmem:[#allocation7 + $0x500] sm:$0xff]  }
 0x1e6   :  { %4295 = vmatpush3.bf16.msra.mxu1 %v4880_v5  ;;  %v4923_v5 = vld [vmem:[#allocation7 + $0x3c0] sm:$0xff]  }
 0x1e7   :  { %4363 = vmatpush3.bf16.msra.mxu0 %v4882_v27  ;;  %4296 = vmatprep.subr.bf16.mxu1 %v4883_v30  ;;  %v1629_v27 = vadd.f32 %v1628_v21, %v5205_v38  ;;  %v1691_v30 = vpop.f32.mrf.mxu1 }
 0x1e8   :  { %4364 = vmatprep.subr.bf16.mxu0 %v4885_v31  ;;  %v4924_v31 = vld [vmem:[#allocation7 + $0x380] sm:$0xff]  }
 0x1ea   :  { %4297 = vmatpush3.bf16.msra.mxu1 %v4884_v37  ;;  %v1684_v37 = vadd.f32 %v5239_v35, %v1621_v61  ;;  %v4929_v35 = vld [vmem:[#allocation7 + $0x4e8] sm:$0xff]  }
 0x1eb   :  { %4365 = vmatpush3.bf16.msra.mxu0 %v4886_v17  ;;  %4298 = vmatprep.subr.bf16.mxu1 %v4887_v23  ;;  %v4925_v17 = vld [vmem:[#allocation7 + $0x4f8] sm:$0xff]   ;;  %v1718_v23 = vpack.c.bf16 %v5181_v54, %v5181_v54  ;;  %v4932_v54 = vld [vmem:[#allocation7 + $0x4a0] sm:$0xff]  }
 0x1ec   :  { %4366 = vmatprep.subr.bf16.mxu0 %v4889_v40  ;;  %v1692_v40 = vadd.f32 %v1691_v30, %v1629_v27  ;;  %v1712_v4 = vpack.c.bf16 %v1684_v37, %v1684_v37 }
 0x1ee   :  { %4299 = vmatpush3.bf16.msra.mxu1 %v4888_v43  ;;  %v1717_v38 = vpack.c.bf16 %v1692_v40, %v1692_v40  ;;  %v4928_v43 = vld [vmem:[#allocation7 + $0x4b0] sm:$0xff]  }
 0x1ef   :  { %4367 = vmatpush3.bf16.msra.mxu0 %v4890_v45  ;;  %4300 = vmatprep.subr.bf16.mxu1 %v4891_v22  ;;  %v4931_v45 = vld [vmem:[#allocation7 + $0x4e0] sm:$0xff]   ;;  %v4933_v22 = vld [vmem:[#allocation7 + $0x4d8] sm:$0xff]  }
 0x1f0   :  { %4396 = vmatprep.subr.bf16.mxu0 %v4893_v49  ;;  %v4935_v49 = vld [vmem:[#allocation7 + $0x4d0] sm:$0xff]  }
 0x1f2   :  { %4301 = vmatpush3.bf16.msra.mxu1 %v4892_v55  ;;  %3370 = vmatmul.mubr.bf16.vlgmr.msra.gmra.mxu0 %v1714_v46  ;;  %v4936_v55 = vld [vmem:[#allocation7 + $0x490] sm:$0xff]   ;;  %v1693_v46 = vpop.f32.mrf.mxu1 }
 0x1f3   :  { %4397 = vmatpush3.bf16.msra.mxu0 %v4894_v57  ;;  %3707 = vmatprep.mubr.bf16.mxu0 %v1719_v28  ;;  %v1632_v57 = vpop.f32.mrf.mxu0 }
 0x1f4   :  { %4330 = vmatprep.subr.bf16.mxu1 %v4895_v33  ;;  %4398 = vmatprep.subr.bf16.mxu0 %v4897_v10  ;;  %v1627_v33 = vadd.f32 %v5249_v12, %v5203_v32  ;;  %v4939_v10 = vld [vmem:[#allocation7 + $0x4c0] sm:$0xff]   ;;  %v1633_v28 = vadd.f32 %v1632_v57, %v5209_v42  ;;  %v4954_v12 = vld [vmem:[#allocation7 + $0x588] sm:$0xff]  }
 0x1f5   :  { %2734 = vmatmul.mubr.bf16.vlgmr.msra.gmra.mxu1 %v1708_v53  ;;  %v4940_v53 = vld [vmem:[#allocation7 + $0x480] sm:$0xff]  }
 0x1f6   :  { %4331 = vmatpush3.bf16.msra.mxu1 %v4896_v11  ;;  %3071 = vmatprep.mubr.bf16.mxu1 %v1713_v29  ;;  %v1695_v11 = vpop.f32.mrf.mxu1 }
 0x1f7   :  { %4399 = vmatpush3.bf16.msra.mxu0 %v4898_v34  ;;  %4332 = vmatprep.subr.bf16.mxu1 %v4899_v59  ;;  %v1690_v34 = vadd.f32 %v1689_v25, %v1627_v33  ;;  %v4941_v59 = vld [vmem:[#allocation7 + $0x5f8] sm:$0xff]   ;;  %v1696_v29 = vadd.f32 %v1695_v11, %v1633_v28 }
 0x1f8   :  { %4400 = vmatprep.subr.bf16.mxu0 %v4901_v15 }
 0x1fa   :  { %4333 = vmatpush3.bf16.msra.mxu1 %v4900_v50  ;;  %v4942_v50 = vld [vmem:[#allocation7 + $0x5b8] sm:$0xff]  }
 0x1fb   :  { %4401 = vmatpush3.bf16.msra.mxu0 %v4902_v16  ;;  %4334 = vmatprep.subr.bf16.mxu1 %v4903_v58  ;;  %v1716_v16 = vpack.c.bf16 %v1690_v34, %v1690_v34  ;;  %v4943_v58 = vld [vmem:[#allocation7 + $0x5f0] sm:$0xff]  }
 0x1fc   :  { %4402 = vmatprep.subr.bf16.mxu0 %v4905_v60  ;;  %v1721_v60 = vpack.c.bf16 %v1696_v29, %v1696_v29 }
 0x1fe   :  { %4335 = vmatpush3.bf16.msra.mxu1 %v4904_v2 }
 0x1ff   :  { %4403 = vmatpush3.bf16.msra.mxu0 %v4906_v63  ;;  %4336 = vmatprep.subr.bf16.mxu1 %v4907_v0  ;;  %v4944_v63 = vld [vmem:[#allocation7 + $0x5b0] sm:$0xff]   ;;  %v4945_v0 = vld [vmem:[#allocation7 + $0x5e8] sm:$0xff]  }
 0x200   :  { %4404 = vmatprep.subr.bf16.mxu0 %v4909_v9 }
 0x202   :  { %4337 = vmatpush3.bf16.msra.mxu1 %v4908_v24  ;;  %v4946_v24 = vld [vmem:[#allocation7 + $0x5a8] sm:$0xff]  }
 0x203   :  { %4405 = vmatpush3.bf16.msra.mxu0 %v4910_v26  ;;  %4338 = vmatprep.subr.bf16.mxu1 %v4911_v52  ;;  %v4947_v26 = vld [vmem:[#allocation7 + $0x5e0] sm:$0xff]  }
 0x204   :  { %4406 = vmatprep.subr.bf16.mxu0 %v4913_v1  ;;  %v4948_v52 = vld [vmem:[#allocation7 + $0x5a0] sm:$0xff]   ;;  %v4949_v1 = vld [vmem:[#allocation7 + $0x5d8] sm:$0xff]  }
 0x206   :  { %4339 = vmatpush3.bf16.msra.mxu1 %v4912_v8  ;;  %v4950_v8 = vld [vmem:[#allocation7 + $0x598] sm:$0xff]  }
 0x207   :  { %4407 = vmatpush3.bf16.msra.mxu0 %v4914_v3  ;;  %4340 = vmatprep.subr.bf16.mxu1 %v4915_v47  ;;  %v4951_v3 = vld [vmem:[#allocation7 + $0x5d0] sm:$0xff]  }
 0x208   :  { %4408 = vmatprep.subr.bf16.mxu0 %v4917_v51  ;;  %v4952_v47 = vld [vmem:[#allocation7 + $0x590] sm:$0xff]   ;;  %v4953_v51 = vld [vmem:[#allocation7 + $0x5c8] sm:$0xff]  }
 0x20a   :  { %4341 = vmatpush3.bf16.msra.mxu1 %v4916_v13  ;;  %v1631_v13 = vadd.f32 %v1630_v36, %v5207_v39 }
 0x20b   :  { %4409 = vmatpush3.bf16.msra.mxu0 %v4918_v14  ;;  %4342 = vmatprep.subr.bf16.mxu1 %v4919_v19  ;;  %v4955_v14 = vld [vmem:[#allocation7 + $0x5c0] sm:$0xff]  }
 0x20c   :  { %4410 = vmatprep.subr.bf16.mxu0 %v4921_v20  ;;  %v4956_v19 = vld [vmem:[#allocation7 + $0x580] sm:$0xff]   ;;  %v1694_v20 = vadd.f32 %v1693_v46, %v1631_v13 }
 0x20e   :  { %4343 = vmatpush3.bf16.msra.mxu1 %v4920_v7  ;;  %v1720_v25 = vpack.c.bf16 %v1694_v20, %v1694_v20 }
 0x20f   :  { %4411 = vmatpush3.bf16.msra.mxu0 %v4922_v62  ;;  %4344 = vmatprep.subr.bf16.mxu1 %v4923_v5 }
 0x212   :  { %4345 = vmatpush3.bf16.msra.mxu1 %v4924_v31  ;;  %3708 = vmatmul.mubr.bf16.vlgmr.msra.gmra.mxu0 %v1718_v23 }
 0x213   :  { %4374 = vmatprep.subr.bf16.mxu1 %v4925_v17 }
 0x215   :  { %3072 = vmatmul.mubr.bf16.vlgmr.msra.gmra.mxu1 %v1712_v4 }
 0x216   :  { %4375 = vmatpush3.bf16.msra.mxu1 %v4926_v6  ;;  %3409 = vmatprep.mubr.bf16.mxu1 %v1717_v38 }
 0x217   :  { %4376 = vmatprep.subr.bf16.mxu1 %v4927_v41 }
 0x21a   :  { %4377 = vmatpush3.bf16.msra.mxu1 %v4928_v43 }
 0x21b   :  { %4378 = vmatprep.subr.bf16.mxu1 %v4929_v35 }
 0x21e   :  { %4379 = vmatpush3.bf16.msra.mxu1 %v4930_v44 }
 0x21f   :  { %4380 = vmatprep.subr.bf16.mxu1 %v4931_v45 }
 0x222   :  { %4381 = vmatpush3.bf16.msra.mxu1 %v4932_v54  ;;  %v3983_v54 = vld [vmem:[%s5270_s3] ss:$0 sm:$0xff]  ;;  %s5056_s3 = smov [#allocation8]  }
 0x223   :  { %4382 = vmatprep.subr.bf16.mxu1 %v4933_v22  ;;  %s3763_s9 = sshll.u32 %s5056_s3, 4  ;;  %s3764_s9 = int_to_ptr.vmem [resolvable:$true] %s3763_s9 }
 0x224   :  { %s5021_s10 = scalar_lea.vmem %s3764_s9, 128  ;;  %p5026_p2 = scmp.lt.s32.totalorder %s3764_s9, %s3764_s9 }
 0x225   :  { %p5022_p1 = scmp.ne.s32.totalorder %s3764_s9, %s5021_s10  ;;  %p5027_p3 = scmp.lt.s32.totalorder %s5021_s10, %s5021_s10 }
 0x226   :  { %4383 = vmatpush3.bf16.msra.mxu1 %v4934_v48 }
 0x227   :  { %4384 = vmatprep.subr.bf16.mxu1 %v4935_v49  ;;  %p5028_p4 = por %p5027_p3, %p5026_p2 }
 0x229   :  { %p5029_p5 = pnand %p5028_p4, %p5022_p1 }
 0x22a   :  { %4385 = vmatpush3.bf16.msra.mxu1 %v4936_v55 }
 0x22b   :  { %4386 = vmatprep.subr.bf16.mxu1 %v4937_v56 }
 0x22e   :  { %4387 = vmatpush3.bf16.msra.mxu1 %v4938_v18 }
 0x22f   :  { %4388 = vmatprep.subr.bf16.mxu1 %v4939_v10 }
 0x232   :  { %4389 = vmatpush3.bf16.msra.mxu1 %v4940_v53  ;;  %v4192_v15 = vpop.f32.mrf.mxu0 }
 0x233   :  { %4418 = vmatprep.subr.bf16.mxu1 %v4941_v59 }
 0x234   :  { %v4193_v2 = vpop.f32.mrf.mxu0 }
 0x235   :  { %3410 = vmatmul.mubr.bf16.vlgmr.msra.gmra.mxu1 %v1716_v16  ;;  %v4194_v32 = vadd.f32 %v4193_v2, %v4192_v15 }
 0x236   :  { %4419 = vmatpush3.bf16.msra.mxu1 %v4942_v50  ;;  %3747 = vmatprep.mubr.bf16.mxu1 %v1721_v60  ;;  %v4195_v42 = vpop.f32.mrf.mxu0 }
 0x237   :  { %4420 = vmatprep.subr.bf16.mxu1 %v4943_v58 }
 0x238   :  { %v4196_v9 = vpop.f32.mrf.mxu0 }
 0x23a   :  { %4421 = vmatpush3.bf16.msra.mxu1 %v4944_v63 }
 0x23b   :  { %4422 = vmatprep.subr.bf16.mxu1 %v4945_v0 }
 0x23e   :  { %4423 = vmatpush3.bf16.msra.mxu1 %v4946_v24 }
 0x23f   :  { %4424 = vmatprep.subr.bf16.mxu1 %v4947_v26 }
 0x242   :  { %4425 = vmatpush3.bf16.msra.mxu1 %v4948_v52 }
 0x243   :  { %4426 = vmatprep.subr.bf16.mxu1 %v4949_v1 }
 0x246   :  { %4427 = vmatpush3.bf16.msra.mxu1 %v4950_v8 }
 0x247   :  { %4428 = vmatprep.subr.bf16.mxu1 %v4951_v3 }
 0x24a   :  { %4429 = vmatpush3.bf16.msra.mxu1 %v4952_v47 }
 0x24b   :  { %4430 = vmatprep.subr.bf16.mxu1 %v4953_v51 }
 0x24e   :  { %4431 = vmatpush3.bf16.msra.mxu1 %v4954_v12 }
 0x24f   :  { %4432 = vmatprep.subr.bf16.mxu1 %v4955_v14 }
 0x252   :  { %4433 = vmatpush3.bf16.msra.mxu1 %v4956_v19  ;;  %v4236_v21 = vpop.f32.mrf.mxu0 }
 0x254   :  { %v4237_v7 = vpop.f32.mrf.mxu0 }
 0x255   :  { %v4238_v61 = vadd.f32 %v4237_v7, %v4236_v21  ;;  %3748 = vmatmul.mubr.bf16.vlgmr.msra.gmra.mxu1 %v1720_v25 }
 0x256   :  { %v4239_v62 = vpop.f32.mrf.mxu0 }
 0x258   :  { %v4240_v5 = vpop.f32.mrf.mxu0 }
 0x272   :  { %v4280_v27 = vpop.f32.mrf.mxu0 }
 0x274   :  { %v4281_v30 = vpop.f32.mrf.mxu0 }
 0x275   :  { %v4282_v31 = vadd.f32 %v4281_v30, %v4280_v27  ;;  %v4214_v37 = vpop.f32.mrf.mxu1 }
 0x276   :  { %v4283_v17 = vpop.f32.mrf.mxu0 }
 0x277   :  { %v4215_v39 = vpop.f32.mrf.mxu1 }
 0x278   :  { %v4216_v23 = vadd.f32 %v4215_v39, %v4214_v37  ;;  %v4284_v40 = vpop.f32.mrf.mxu0 }
 0x279   :  { %v4217_v6 = vpop.f32.mrf.mxu1 }
 0x27a   :  { %v2060_v4 = vadd.f32 %v4216_v23, %v4194_v32 }
 0x27b   :  { %v4218_v41 = vpop.f32.mrf.mxu1 }
 0x27c   :  { %v2065_v55 = vadd.f32 %v3983_v54, %v2060_v4 }
 0x292   :  { %v4324_v38 = vpop.f32.mrf.mxu0 }
 0x294   :  { %v4325_v43 = vpop.f32.mrf.mxu0 }
 0x295   :  { %v4258_v35 = vpop.f32.mrf.mxu1  ;;  %v4326_v44 = vadd.f32 %v4325_v43, %v4324_v38 }
 0x296   :  { %v4327_v45 = vpop.f32.mrf.mxu0 }
 0x297   :  { %v4259_v22 = vpop.f32.mrf.mxu1 }
 0x298   :  { %v4260_v48 = vadd.f32 %v4259_v22, %v4258_v35  ;;  %v4328_v49 = vpop.f32.mrf.mxu0 }
 0x299   :  { %v4261_v36 = vpop.f32.mrf.mxu1 }
 0x29a   :  { %v2398_v56 = vadd.f32 %v4260_v48, %v4238_v61 }
 0x29b   :  { %v4262_v57 = vpop.f32.mrf.mxu1 }
 0x29c   :  { %v2403_v46 = vadd.f32 %v2398_v56, %v2065_v55 }
 0x2b2   :  { %v4368_v18 = vpop.f32.mrf.mxu0 }
 0x2b4   :  { %v4369_v33 = vpop.f32.mrf.mxu0 }
 0x2b5   :  { %v4302_v10 = vpop.f32.mrf.mxu1  ;;  %v4370_v28 = vadd.f32 %v4369_v33, %v4368_v18 }
 0x2b6   :  { %v4371_v11 = vpop.f32.mrf.mxu0 }
 0x2b7   :  { %v4303_v53 = vpop.f32.mrf.mxu1 }
 0x2b8   :  { %v4304_v34 = vadd.f32 %v4303_v53, %v4302_v10  ;;  %v4372_v59 = vpop.f32.mrf.mxu0 }
 0x2b9   :  { %v4305_v29 = vpop.f32.mrf.mxu1 }
 0x2ba   :  { %v2736_v15 = vadd.f32 %v4304_v34, %v4282_v31 }
 0x2bb   :  { %v4306_v50 = vpop.f32.mrf.mxu1 }
 0x2bc   :  { %v2741_v16 = vadd.f32 %v2736_v15, %v2403_v46 }
 0x2d2   :  { %v4412_v58 = vpop.f32.mrf.mxu0 }
 0x2d4   :  { %v4413_v60 = vpop.f32.mrf.mxu0 }
 0x2d5   :  { %v4346_v2 = vpop.f32.mrf.mxu1  ;;  %v4414_v32 = vadd.f32 %v4413_v60, %v4412_v58 }
 0x2d6   :  { %v4415_v42 = vpop.f32.mrf.mxu0 }
 0x2d7   :  { %v4347_v63 = vpop.f32.mrf.mxu1 }
 0x2d8   :  { %v4348_v0 = vadd.f32 %v4347_v63, %v4346_v2  ;;  %v4416_v9 = vpop.f32.mrf.mxu0 }
 0x2d9   :  { %v4349_v24 = vpop.f32.mrf.mxu1 }
 0x2da   :  { %v3074_v26 = vadd.f32 %v4348_v0, %v4326_v44 }
 0x2db   :  { %v4350_v52 = vpop.f32.mrf.mxu1 }
 0x2dc   :  { %v3079_v1 = vadd.f32 %v3074_v26, %v2741_v16 }
 0x2f5   :  { %v4390_v8 = vpop.f32.mrf.mxu1 }
 0x2f7   :  { %v4391_v3 = vpop.f32.mrf.mxu1 }
 0x2f8   :  { %v4392_v47 = vadd.f32 %v4391_v3, %v4390_v8 }
 0x2f9   :  { %v4393_v51 = vpop.f32.mrf.mxu1 }
 0x2fa   :  { %v3412_v12 = vadd.f32 %v4392_v47, %v4370_v28 }
 0x2fb   :  { %v4394_v13 = vpop.f32.mrf.mxu1 }
 0x2fc   :  { %v3417_v14 = vadd.f32 %v3412_v12, %v3079_v1 }
 0x315   :  { %v4434_v19 = vpop.f32.mrf.mxu1 }
 0x317   :  { %v4435_v20 = vpop.f32.mrf.mxu1 }
 0x318   :  { %v4436_v21 = vadd.f32 %v4435_v20, %v4434_v19 }
 0x319   :  { %v4437_v25 = vpop.f32.mrf.mxu1 }
 0x31a   :  { %v3750_v7 = vadd.f32 %v4436_v21, %v4414_v32 }
 0x31b   :  { %v4438_v61 = vpop.f32.mrf.mxu1 }
 0x31c   :  { %v3755_v62 = vadd.f32 %v3750_v7, %v3417_v14 }
 0x31e   :  { %3756 = vst [vmem:[#allocation8] sm:$0xff] %v3755_v62 }
 0x31f   :  { %5032 = shalt.err (!%p5029_p5)
}
 0x320   :  { %3766 = dma.vmem_to_hbm [thread:$0]  %s3764_s9, 128, %s5271_s4, [#allocation4]  }
 0x321   :  { %5045 = dma.done.wait [#allocation4], 128  }
 0x322   :  { %5046 = vsyncadd [#allocation4], 4294967168 }
 0x323   :  { %3770 = vsyncpa [#allocation3], 1 }
 0x324   :  { %3771 = vsyncpa [#allocation6], 1 }
 0x325   :  { %3772 = vsyncpa [#allocation4], 1 }

</bundles_post_ra>
